<compile_context>
chip_gen: v7x
topology: tpu7x:2x2x1
jax: 0.10.0
libtpu: 0.0.40
codegen_flags: <defaults>
</compile_context>

<pallas_src>
import jax
import jax.numpy as jnp
from jax.experimental import pallas as pl
from jax.experimental.pallas import tpu as pltpu

H_IN = 3        # e.g. ["moneyness", "expiry_time", "volatility"]
HIDDEN = 32
OUT = 1
TILE_N = 1024   # Monte-Carlo paths per grid step (lane axis)


def _mlp_kernel(x_ref,
                w0_ref, b0_ref,
                w1_ref, b1_ref,
                w2_ref, b2_ref,
                w3_ref, b3_ref,
                w4_ref, b4_ref,
                o_ref):
    # One tile of paths, fully fused in VMEM:
    #   x_ref : (H_IN, T)  features on sublanes, paths on lanes
    #   o_ref : (OUT,  T)  lane-dense output
    x = x_ref[...]                                 # (H_IN, T)  f32
    w0 = w0_ref[...]                               # (HIDDEN, H_IN) f32

    # ---- Layer 0: Linear(3, 32) + ReLU as VPU broadcast FMAs.
    # A K=3 MXU dot would waste ~98% of the contraction dimension.
    h = w0[:, 0:1] * x[0:1, :]                     # (HIDDEN, T)
    for k in range(1, H_IN):
        h = h + w0[:, k:k + 1] * x[k:k + 1, :]
    h = jnp.maximum(h + b0_ref[...], 0.0)

    # ---- Layers 1..3: Linear(32, 32) + ReLU on the MXU.
    # bf16 inputs, f32 accumulation; bias-add / ReLU stay in f32 on the VPU.
    for w_ref, b_ref in ((w1_ref, b1_ref), (w2_ref, b2_ref), (w3_ref, b3_ref)):
        h = jnp.dot(w_ref[...], h.astype(jnp.bfloat16),
                    preferred_element_type=jnp.float32)
        h = jnp.maximum(h + b_ref[...], 0.0)

    # ---- Layer 4: Linear(32, 1) + Identity as VPU multiply + sublane reduce.
    y = jnp.sum(w4_ref[...] * h, axis=0, keepdims=True) + b4_ref[...]
    o_ref[...] = y.astype(o_ref.dtype)             # (OUT, T) lane-dense store


def hedger_forward(x, params, tile_n=TILE_N):
    """Hedger.forward: (N, H_in) -> (N, 1) hedge ratio."""
    n, h_in = x.shape
    assert h_in == H_IN
    (w0, b0), (w1, b1), (w2, b2), (w3, b3), (w4, b4) = params

    # Batch-on-lanes layout: paths on the lane axis; pad N instead of asserting.
    xt = x.astype(jnp.float32).T                   # (H_IN, N)
    tile_n = min(tile_n, pl.cdiv(n, 128) * 128)
    n_pad = pl.cdiv(n, tile_n) * tile_n
    if n_pad != n:
        xt = jnp.pad(xt, ((0, 0), (0, n_pad - n)))

    grid = (n_pad // tile_n,)

    def replicated(arr):
        # full-array block, same block for every grid step
        return pl.BlockSpec(arr.shape, lambda i: (0, 0))

    out_t = pl.pallas_call(
        _mlp_kernel,
        out_shape=jax.ShapeDtypeStruct((OUT, n_pad), jnp.float32),
        grid_spec=pltpu.PrefetchScalarGridSpec(
            num_scalar_prefetch=0,
            grid=grid,
            in_specs=[
                pl.BlockSpec((H_IN, tile_n), lambda i: (0, i)),   # x tile
                replicated(w0), replicated(b0),
                replicated(w1), replicated(b1),
                replicated(w2), replicated(b2),
                replicated(w3), replicated(b3),
                replicated(w4), replicated(b4),
            ],
            out_specs=pl.BlockSpec((OUT, tile_n), lambda i: (0, i)),
        ),
        compiler_params=pltpu.CompilerParams(
            dimension_semantics=("parallel",)),
    )(xt, w0, b0, w1, b1, w2, b2, w3, b3, w4, b4)

    return out_t[:, :n].T                          # (N, OUT)


def init_params(key):
    """Deterministic init mimicking torch.nn.Linear default (uniform +-1/sqrt(fan_in)).

    Weights are stored in the layouts the kernel expects:
      w0     : (HIDDEN, H_IN)   f32   (out, in)  -- VPU layer
      w1..w3 : (HIDDEN, HIDDEN) bf16  (out, in)  -- MXU layers (bf16 inputs)
      w4     : (HIDDEN, OUT)    f32   (in, out)  -- VPU/XLU layer
      biases : (out, 1) f32  (b4 is (1, OUT))
    """
    dims = [(H_IN, HIDDEN), (HIDDEN, HIDDEN), (HIDDEN, HIDDEN),
            (HIDDEN, HIDDEN), (HIDDEN, OUT)]
    params = []
    for li, (fan_in, fan_out) in enumerate(dims):
        key, kw, kb = jax.random.split(key, 3)
        bound = 1.0 / float(fan_in) ** 0.5
        w = jax.random.uniform(kw, (fan_out, fan_in), jnp.float32, -bound, bound)
        b = jax.random.uniform(kb, (fan_out, 1), jnp.float32, -bound, bound)
        if li in (1, 2, 3):
            w = w.astype(jnp.bfloat16)             # MXU-facing layers
        if li == 4:
            w = w.T                                # (HIDDEN, OUT) for VPU/XLU path
            b = b.reshape(1, OUT)
        params.append((w, b))
    return params


def _reference_forward(x, params):
    """Plain-JAX reference with the same layout and bf16 casts as the kernel."""
    (w0, b0), (w1, b1), (w2, b2), (w3, b3), (w4, b4) = params
    h = x.astype(jnp.float32).T                    # (H_IN, N)
    h = jnp.maximum(jnp.dot(w0, h) + b0, 0.0)
    for w, b in ((w1, b1), (w2, b2), (w3, b3)):
        h = jnp.dot(w, h.astype(jnp.bfloat16),
                    preferred_element_type=jnp.float32)
        h = jnp.maximum(h + b, 0.0)
    y = jnp.sum(w4 * h, axis=0, keepdims=True) + b4
    return y.T                                     # (N, OUT)


if __name__ == "__main__":
    key = jax.random.PRNGKey(0)
    key, kx = jax.random.split(key)

    N = 2000  # Monte-Carlo paths; deliberately NOT a multiple of TILE_N
    x = jax.random.normal(kx, (N, H_IN), jnp.float32)  # (N, H_in) features
    params = init_params(key)

    out = jax.block_until_ready(hedger_forward(x, params))
    ref = _reference_forward(x, params)

    assert out.shape == (N, OUT)
    assert jnp.allclose(out, ref, atol=1e-3, rtol=1e-3), "mismatch vs reference"

    print("KERNEL_OK")
</pallas_src>

<mosaic_0001>
module attributes {stable_mosaic.version = 11 : i64} {
  func.func @_mlp_kernel(%arg0: i32, %arg1: memref<3x1024xf32, #tpu.memory_space<vmem>>, %arg2: memref<32x3xf32, #tpu.memory_space<vmem>>, %arg3: memref<32x1xf32, #tpu.memory_space<vmem>>, %arg4: memref<32x32xbf16, #tpu.memory_space<vmem>>, %arg5: memref<32x1xf32, #tpu.memory_space<vmem>>, %arg6: memref<32x32xbf16, #tpu.memory_space<vmem>>, %arg7: memref<32x1xf32, #tpu.memory_space<vmem>>, %arg8: memref<32x32xbf16, #tpu.memory_space<vmem>>, %arg9: memref<32x1xf32, #tpu.memory_space<vmem>>, %arg10: memref<32x1xf32, #tpu.memory_space<vmem>>, %arg11: memref<1x1xf32, #tpu.memory_space<vmem>>, %arg12: memref<1x1024xf32, #tpu.memory_space<vmem>>) attributes {dimension_semantics = [#tpu.dimension_semantics<parallel>], iteration_bounds = array<i64: 2>, scalar_prefetch = 0 : i64, scratch_operands = 0 : i64, tpu.core_type = #tpu.core_type<tc>, window_params = [{transform_indices = @transform_0, window_bounds = array<i64: 3, 1024>}, {pipeline_mode = #tpu.pipeline_mode<synchronous>, transform_indices = @transform_1, window_bounds = array<i64: 32, 3>}, {pipeline_mode = #tpu.pipeline_mode<synchronous>, transform_indices = @transform_2, window_bounds = array<i64: 32, 1>}, {pipeline_mode = #tpu.pipeline_mode<synchronous>, transform_indices = @transform_3, window_bounds = array<i64: 32, 32>}, {pipeline_mode = #tpu.pipeline_mode<synchronous>, transform_indices = @transform_4, window_bounds = array<i64: 32, 1>}, {pipeline_mode = #tpu.pipeline_mode<synchronous>, transform_indices = @transform_5, window_bounds = array<i64: 32, 32>}, {pipeline_mode = #tpu.pipeline_mode<synchronous>, transform_indices = @transform_6, window_bounds = array<i64: 32, 1>}, {pipeline_mode = #tpu.pipeline_mode<synchronous>, transform_indices = @transform_7, window_bounds = array<i64: 32, 32>}, {pipeline_mode = #tpu.pipeline_mode<synchronous>, transform_indices = @transform_8, window_bounds = array<i64: 32, 1>}, {pipeline_mode = #tpu.pipeline_mode<synchronous>, transform_indices = @transform_9, window_bounds = array<i64: 32, 1>}, {pipeline_mode = #tpu.pipeline_mode<synchronous>, transform_indices = @transform_10, window_bounds = array<i64: 1, 1>}, {transform_indices = @transform_11, window_bounds = array<i64: 1, 1024>}]} {
    %c0 = arith.constant 0 : index
    %c0_0 = arith.constant 0 : index
    %0 = vector.load %arg1[%c0, %c0_0] : memref<3x1024xf32, #tpu.memory_space<vmem>>, vector<3x1024xf32>
    %c0_1 = arith.constant 0 : index
    %c0_2 = arith.constant 0 : index
    %1 = vector.load %arg2[%c0_1, %c0_2] : memref<32x3xf32, #tpu.memory_space<vmem>>, vector<32x3xf32>
    %2 = vector.extract_strided_slice %1 {offsets = [0, 0], sizes = [32, 1], strides = [1, 1]} : vector<32x3xf32> to vector<32x1xf32>
    %3 = vector.extract_strided_slice %0 {offsets = [0, 0], sizes = [1, 1024], strides = [1, 1]} : vector<3x1024xf32> to vector<1x1024xf32>
    %4 = vector.broadcast %2 : vector<32x1xf32> to vector<32x1024xf32>
    %5 = vector.broadcast %3 : vector<1x1024xf32> to vector<32x1024xf32>
    %6 = arith.mulf %4, %5 : vector<32x1024xf32>
    %7 = vector.extract_strided_slice %1 {offsets = [0, 1], sizes = [32, 1], strides = [1, 1]} : vector<32x3xf32> to vector<32x1xf32>
    %8 = vector.extract_strided_slice %0 {offsets = [1, 0], sizes = [1, 1024], strides = [1, 1]} : vector<3x1024xf32> to vector<1x1024xf32>
    %9 = vector.broadcast %7 : vector<32x1xf32> to vector<32x1024xf32>
    %10 = vector.broadcast %8 : vector<1x1024xf32> to vector<32x1024xf32>
    %11 = arith.mulf %9, %10 : vector<32x1024xf32>
    %12 = arith.addf %6, %11 : vector<32x1024xf32>
    %13 = vector.extract_strided_slice %1 {offsets = [0, 2], sizes = [32, 1], strides = [1, 1]} : vector<32x3xf32> to vector<32x1xf32>
    %14 = vector.extract_strided_slice %0 {offsets = [2, 0], sizes = [1, 1024], strides = [1, 1]} : vector<3x1024xf32> to vector<1x1024xf32>
    %15 = vector.broadcast %13 : vector<32x1xf32> to vector<32x1024xf32>
    %16 = vector.broadcast %14 : vector<1x1024xf32> to vector<32x1024xf32>
    %17 = arith.mulf %15, %16 : vector<32x1024xf32>
    %18 = arith.addf %12, %17 : vector<32x1024xf32>
    %c0_3 = arith.constant 0 : index
    %c0_4 = arith.constant 0 : index
    %19 = vector.load %arg3[%c0_3, %c0_4] : memref<32x1xf32, #tpu.memory_space<vmem>>, vector<32x1xf32>
    %20 = vector.broadcast %19 : vector<32x1xf32> to vector<32x1024xf32>
    %21 = arith.addf %18, %20 : vector<32x1024xf32>
    %cst = arith.constant 0.000000e+00 : f32
    %22 = vector.broadcast %cst : f32 to vector<32x1024xf32>
    %23 = arith.maximumf %21, %22 : vector<32x1024xf32>
    %c0_5 = arith.constant 0 : index
    %c0_6 = arith.constant 0 : index
    %24 = vector.load %arg4[%c0_5, %c0_6] : memref<32x32xbf16, #tpu.memory_space<vmem>>, vector<32x32xbf16>
    %25 = arith.truncf %23 : vector<32x1024xf32> to vector<32x1024xbf16>
    %cst_7 = arith.constant dense<0.000000e+00> : vector<32x1024xf32>
    %26 = tpu.matmul %24, %25, %cst_7 {dimension_numbers = #tpu.dot_dimension_numbers<[1], [0], [0], [1], [0, 0, 1, 1], [], []>} : vector<32x32xbf16>, vector<32x1024xbf16>, vector<32x1024xf32> -> vector<32x1024xf32>
    %c0_8 = arith.constant 0 : index
    %c0_9 = arith.constant 0 : index
    %27 = vector.load %arg5[%c0_8, %c0_9] : memref<32x1xf32, #tpu.memory_space<vmem>>, vector<32x1xf32>
    %28 = vector.broadcast %27 : vector<32x1xf32> to vector<32x1024xf32>
    %29 = arith.addf %26, %28 : vector<32x1024xf32>
    %cst_10 = arith.constant 0.000000e+00 : f32
    %30 = vector.broadcast %cst_10 : f32 to vector<32x1024xf32>
    %31 = arith.maximumf %29, %30 : vector<32x1024xf32>
    %c0_11 = arith.constant 0 : index
    %c0_12 = arith.constant 0 : index
    %32 = vector.load %arg6[%c0_11, %c0_12] : memref<32x32xbf16, #tpu.memory_space<vmem>>, vector<32x32xbf16>
    %33 = arith.truncf %31 : vector<32x1024xf32> to vector<32x1024xbf16>
    %cst_13 = arith.constant dense<0.000000e+00> : vector<32x1024xf32>
    %34 = tpu.matmul %32, %33, %cst_13 {dimension_numbers = #tpu.dot_dimension_numbers<[1], [0], [0], [1], [0, 0, 1, 1], [], []>} : vector<32x32xbf16>, vector<32x1024xbf16>, vector<32x1024xf32> -> vector<32x1024xf32>
    %c0_14 = arith.constant 0 : index
    %c0_15 = arith.constant 0 : index
    %35 = vector.load %arg7[%c0_14, %c0_15] : memref<32x1xf32, #tpu.memory_space<vmem>>, vector<32x1xf32>
    %36 = vector.broadcast %35 : vector<32x1xf32> to vector<32x1024xf32>
    %37 = arith.addf %34, %36 : vector<32x1024xf32>
    %cst_16 = arith.constant 0.000000e+00 : f32
    %38 = vector.broadcast %cst_16 : f32 to vector<32x1024xf32>
    %39 = arith.maximumf %37, %38 : vector<32x1024xf32>
    %c0_17 = arith.constant 0 : index
    %c0_18 = arith.constant 0 : index
    %40 = vector.load %arg8[%c0_17, %c0_18] : memref<32x32xbf16, #tpu.memory_space<vmem>>, vector<32x32xbf16>
    %41 = arith.truncf %39 : vector<32x1024xf32> to vector<32x1024xbf16>
    %cst_19 = arith.constant dense<0.000000e+00> : vector<32x1024xf32>
    %42 = tpu.matmul %40, %41, %cst_19 {dimension_numbers = #tpu.dot_dimension_numbers<[1], [0], [0], [1], [0, 0, 1, 1], [], []>} : vector<32x32xbf16>, vector<32x1024xbf16>, vector<32x1024xf32> -> vector<32x1024xf32>
    %c0_20 = arith.constant 0 : index
    %c0_21 = arith.constant 0 : index
    %43 = vector.load %arg9[%c0_20, %c0_21] : memref<32x1xf32, #tpu.memory_space<vmem>>, vector<32x1xf32>
    %44 = vector.broadcast %43 : vector<32x1xf32> to vector<32x1024xf32>
    %45 = arith.addf %42, %44 : vector<32x1024xf32>
    %cst_22 = arith.constant 0.000000e+00 : f32
    %46 = vector.broadcast %cst_22 : f32 to vector<32x1024xf32>
    %47 = arith.maximumf %45, %46 : vector<32x1024xf32>
    %c0_23 = arith.constant 0 : index
    %c0_24 = arith.constant 0 : index
    %48 = vector.load %arg10[%c0_23, %c0_24] : memref<32x1xf32, #tpu.memory_space<vmem>>, vector<32x1xf32>
    %49 = vector.broadcast %48 : vector<32x1xf32> to vector<32x1024xf32>
    %50 = arith.mulf %49, %47 : vector<32x1024xf32>
    %cst_25 = arith.constant dense<0.000000e+00> : vector<1024xf32>
    %51 = vector.multi_reduction <add>, %50, %cst_25 [0] : vector<32x1024xf32> to vector<1024xf32>
    %52 = vector.shape_cast %51 : vector<1024xf32> to vector<1x1024xf32>
    %c0_26 = arith.constant 0 : index
    %c0_27 = arith.constant 0 : index
    %53 = vector.load %arg11[%c0_26, %c0_27] : memref<1x1xf32, #tpu.memory_space<vmem>>, vector<1x1xf32>
    %54 = vector.broadcast %53 : vector<1x1xf32> to vector<1x1024xf32>
    %55 = arith.addf %52, %54 : vector<1x1024xf32>
    %c0_28 = arith.constant 0 : index
    %c0_29 = arith.constant 0 : index
    %56 = vector.load %arg12[%c0_28, %c0_29] : memref<1x1024xf32, #tpu.memory_space<vmem>>, vector<1x1024xf32>
    tpu.vector_store %arg12[%c0_28, %c0_29], %55 {strides = array<i32>} : memref<1x1024xf32, #tpu.memory_space<vmem>>, vector<1x1024xf32>,
    return
  }
  func.func @transform_0(%arg0: i32) -> (i32, i32) {
    %c0_i32 = arith.constant 0 : i32
    %c0_i32_0 = arith.constant 0 : i32
    return %c0_i32, %arg0 : i32, i32
  }
  func.func @transform_1(%arg0: i32) -> (i32, i32) {
    %c0_i32 = arith.constant 0 : i32
    %c0_i32_0 = arith.constant 0 : i32
    %c0_i32_1 = arith.constant 0 : i32
    return %c0_i32, %c0_i32_0 : i32, i32
  }
  func.func @transform_2(%arg0: i32) -> (i32, i32) {
    %c0_i32 = arith.constant 0 : i32
    %c0_i32_0 = arith.constant 0 : i32
    %c0_i32_1 = arith.constant 0 : i32
    return %c0_i32, %c0_i32_0 : i32, i32
  }
  func.func @transform_3(%arg0: i32) -> (i32, i32) {
    %c0_i32 = arith.constant 0 : i32
    %c0_i32_0 = arith.constant 0 : i32
    %c0_i32_1 = arith.constant 0 : i32
    return %c0_i32, %c0_i32_0 : i32, i32
  }
  func.func @transform_4(%arg0: i32) -> (i32, i32) {
    %c0_i32 = arith.constant 0 : i32
    %c0_i32_0 = arith.constant 0 : i32
    %c0_i32_1 = arith.constant 0 : i32
    return %c0_i32, %c0_i32_0 : i32, i32
  }
  func.func @transform_5(%arg0: i32) -> (i32, i32) {
    %c0_i32 = arith.constant 0 : i32
    %c0_i32_0 = arith.constant 0 : i32
    %c0_i32_1 = arith.constant 0 : i32
    return %c0_i32, %c0_i32_0 : i32, i32
  }
  func.func @transform_6(%arg0: i32) -> (i32, i32) {
    %c0_i32 = arith.constant 0 : i32
    %c0_i32_0 = arith.constant 0 : i32
    %c0_i32_1 = arith.constant 0 : i32
    return %c0_i32, %c0_i32_0 : i32, i32
  }
  func.func @transform_7(%arg0: i32) -> (i32, i32) {
    %c0_i32 = arith.constant 0 : i32
    %c0_i32_0 = arith.constant 0 : i32
    %c0_i32_1 = arith.constant 0 : i32
    return %c0_i32, %c0_i32_0 : i32, i32
  }
  func.func @transform_8(%arg0: i32) -> (i32, i32) {
    %c0_i32 = arith.constant 0 : i32
    %c0_i32_0 = arith.constant 0 : i32
    %c0_i32_1 = arith.constant 0 : i32
    return %c0_i32, %c0_i32_0 : i32, i32
  }
  func.func @transform_9(%arg0: i32) -> (i32, i32) {
    %c0_i32 = arith.constant 0 : i32
    %c0_i32_0 = arith.constant 0 : i32
    %c0_i32_1 = arith.constant 0 : i32
    return %c0_i32, %c0_i32_0 : i32, i32
  }
  func.func @transform_10(%arg0: i32) -> (i32, i32) {
    %c0_i32 = arith.constant 0 : i32
    %c0_i32_0 = arith.constant 0 : i32
    %c0_i32_1 = arith.constant 0 : i32
    return %c0_i32, %c0_i32_0 : i32, i32
  }
  func.func @transform_11(%arg0: i32) -> (i32, i32) {
    %c0_i32 = arith.constant 0 : i32
    %c0_i32_0 = arith.constant 0 : i32
    return %c0_i32, %arg0 : i32, i32
  }
}

</mosaic_0001>

<bundles_post_ra>
// kernel: tpu_custom_call.1
= control target key start
LH: loop header
LB: loop body
LE: loop exit
PB: predicated region body
PF: predicated region fallthrough
CT: control target
= control target key end

     0   :  { %s3167_s0 = inlined_call_operand.vmem [shape: f32[3,2048], index: 0, kind: input, shape index: {}]   ;;  %s3168_s1 = inlined_call_operand.vmem [shape: f32[32,3], index: 1, kind: input, shape index: {}]   ;;  %s3169_s2 = inlined_call_operand.vmem [shape: f32[32,1], index: 2, kind: input, shape index: {}]   ;;  %s3170_s3 = inlined_call_operand.vmem [shape: bf16[32,32], index: 3, kind: input, shape index: {}]   ;;  %s3171_s4 = inlined_call_operand.vmem [shape: f32[32,1], index: 4, kind: input, shape index: {}]   ;;  %s3172_s5 = inlined_call_operand.vmem [shape: bf16[32,32], index: 5, kind: input, shape index: {}]   ;;  %s3173_s6 = inlined_call_operand.vmem [shape: f32[32,1], index: 6, kind: input, shape index: {}]   ;;  %s3174_s7 = inlined_call_operand.vmem [shape: bf16[32,32], index: 7, kind: input, shape index: {}]   ;;  %s3175_s8 = inlined_call_operand.vmem [shape: f32[32,1], index: 8, kind: input, shape index: {}]   ;;  %s3176_s9 = inlined_call_operand.vmem [shape: f32[32,1], index: 9, kind: input, shape index: {}]   ;;  %s3177_s10 = inlined_call_operand.<no memory space> [shape: f32[1,1], index: 10, kind: input, shape index: {}]   ;;  %s3178_s11 = inlined_call_operand.hbm [shape: f32[1,2048], index: 11, kind: output, shape index: {}]  }
   0x1   :  { %v16_v0 = vstv %s3177_s10 }
   0x2   :  { %17 = vst [vmem:[#allocation2] sm:$0x1] %v16_v0 }
   0x3   :  { %18 = vsyncpa [#allocation4], 0 }
   0x4   :  { %20 = vsyncpa [#allocation4 + $0x1], 0  ;;  %s2343_s19 = smov 0   ;;  %s2345_s20 = smov 0  }
   0x5   :  { %s2347_s21 = smov 0   ;;  %s2349_s22 = smov 0  }
   0x6 LB: > { %s2364_s10 = sadd.s32 4294967295, %s2273_s22   ;;  %s2111_s23 = sadd.s32 4294967294, %s2273_s22   ;;  %s2273_s22 = sphi %s2349_s22, %s3248_s22   ;;  %s2269_s21 = sphi %s2347_s21, %s3247_s21   ;;  %s2265_s20 = sphi %s2345_s20, %s3246_s20   ;;  %s2261_s19 = sphi %s2343_s19, %s3245_s19  }
   0x7   : > { %s2368_s24 = sadd.s32 1, %s2273_s22   ;;  %s269_s25 = sadd.s32 1, %s2269_s21 }
   0x8   : > { %s266_s26 = ssub.s32 %s2273_s22, %s2368_s24  ;;  %p279_p0 = scmp.ne.s32.totalorder %s2269_s21, %s2265_s20 }
   0x9   : > { %p267_p1 = scmp.eq.s32.totalorder %s266_s26, 0  ;;  %p280_p2 = scmp.eq.s32.totalorder %s2364_s10, 1 }
   0xa   : > { %p285_p3 = scmp.ne.s32.totalorder %s2265_s20, %s2261_s19  ;;  %p286_p4 = scmp.eq.s32.totalorder %s2111_s23, 1 }
   0xb   : > { %s2379_s27 = scalar_select %p267_p1, %s2269_s21, %s269_s25  }
   0xc   : > { %p2381_p5 = por %p280_p2, %p279_p0  ;;  %p2385_p6 = por %p286_p4, %p285_p3 }
   0xd   : > { %p2114_p7 = scmp.ge.s32.totalorder %s2273_s22, 1  ;;  %p343_p8 = scmp.lt.s32.totalorder %s2273_s22, 3 }
   0xf   : > { %p344_p9 = pnand %p2114_p7, %p343_p8 }
  0x11   : > { %347 = sbr.rel (%p344_p9) target bundleno = 965 (0x3c5), region = 64 }
  0x18   : > { %v395_v1 = vld [vmem:[%s3168_s1] sm:$0xff]  ;;  %v2275_v2 = vmov 2   ;;  %v2276_v3 = vmov 1   ;;  %v397_v4 = vld [vmem:[%s3168_s1 + $0x10] sm:$0xff]  ;;  %v396_v5 = vld [vmem:[%s3168_s1 + $0x8] sm:$0xff]  ;;  %v3179_v6 = vmov 0   ;;  %v423_v29 = vlaneseq }
  0x19   : > { %2198 = vset.pattern.permute.xlu0 %v2275_v2  ;;  %2197 = vset.pattern.permute.xlu1 %v2276_v3  ;;  %v398_v7 = vld [vmem:[%s3168_s1 + $0x18] sm:$0xff]  ;;  %v832_v8 = vld [vmem:[%s3169_s2 + $0x8] sm:$0xff]  ;;  %v939_v9 = vld [vmem:[%s3171_s4] sm:$0xff]  ;;  %s2116_s15 = sshll.u32 %s2364_s10, 3  ;;  %vm973_vm0 = vcmask 261120   ;;  %s380_s26 = sand.u32 1, %s2265_s20  }
  0x1a   : > { %680 = vperm.xlu0 %2198, %v395_v1   ;;  %528 = vperm.xlu1 %2197, %v395_v1   ;;  %v941_v10 = vld [vmem:[%s3171_s4 + $0x10] sm:$0xff]  ;;  %v1244_v11 = vld [vmem:[%s3173_s6] sm:$0xff]  ;;  %v834_v16 = vld [vmem:[%s3169_s2 + $0x18] sm:$0xff]  ;;  %p384_p10 = scmp.lt.s32.totalorder %s2116_s15, 15  ;;  %v2469_v30 = vshrl.u32 %v423_v29, 7  ;;  %s2115_s30 = sshll.u32 %s380_s26, 3 }
  0x1b   : > { %1012 = vmatprep.mubr.bf16.mxu0 %v3179_v6  ;;  %1065 = vmatprep.mubr.bf16.mxu1 %v3179_v6  ;;  %v831_v12 = vld [vmem:[%s3169_s2] sm:$0xff]  ;;  %v1246_v13 = vld [vmem:[%s3173_s6 + $0x10] sm:$0xff]  ;;  %v940_v18 = vld [vmem:[%s3171_s4 + $0x8] sm:$0xff]  ;;  %s2153_s12 = sshll.u32 %s2364_s10, 7  ;;  %s382_s13 = scalar_lea.vmem [#allocation3], %s2115_s30 }
  0x1c   : > { %v833_v14 = vld [vmem:[%s3169_s2 + $0x10] sm:$0xff]  ;;  %v1548_v15 = vld [vmem:[%s3175_s8] sm:$0xff]  ;;  %v942_v20 = vld [vmem:[%s3171_s4 + $0x18] sm:$0xff]  ;;  %s3250_s15 = smov (!%p384_p10, %s2116_s15), 15  ;;  %3202 = vst [vmem:[#allocation6_spill] sm:$0xff] %v2469_v30  ;;  %v429_v31 = vsub.s32 4, %v2469_v30  ;;  %s3125_s17 = scalar_lea.hbm %s3178_s11, %s2153_s12 }
  0x1d   : > { %v1550_v17 = vld [vmem:[%s3175_s8 + $0x10] sm:$0xff]  ;;  %v1832_v19 = vld [vmem:[%s3176_s9] sm:$0xff]  ;;  %v1245_v22 = vld [vmem:[%s3173_s6 + $0x8] sm:$0xff]  ;;  %s2117_s16 = sshll.u32 %s3250_s15, 2  ;;  %v549_v32 = vsub.s32 5, %v2469_v30  ;;  %v701_v33 = vsub.s32 6, %v2469_v30 }
  0x1e   : > { %688 = vperm.xlu0 %2198, %v397_v4   ;;  %532 = vperm.xlu1 %2197, %v396_v5   ;;  %v1834_v21 = vld [vmem:[%s3176_s9 + $0x10] sm:$0xff]  ;;  %v1960_v23 = vld [vmem:[#allocation2] sm:$0x1]  ;;  %v1247_v24 = vld [vmem:[%s3173_s6 + $0x18] sm:$0xff]  ;;  %s387_s23 = scalar_lea.vmem %s3167_s0, %s2117_s16  ;;  %v2478_v35 = vsub.s32 0, %v2469_v30  ;;  %v545_v37 = vsub.s32 1, %v2469_v30 }
  0x1f   : > { %v1549_v25 = vld [vmem:[%s3175_s8 + $0x8] sm:$0xff]  ;;  %v1551_v26 = vld [vmem:[%s3175_s8 + $0x18] sm:$0xff]  ;;  %v391_v34 = vld [vmem:[%s387_s23] sm:$0x77]  ;;  %v697_v45 = vsub.s32 2, %v2469_v30  ;;  %s2052_s14 = sshll.u32 %s382_s13, 4  ;;  %s3127_s14 = int_to_ptr.vmem [resolvable:$true] %s2052_s14 }
  0x20   : > { %v1833_v27 = vld [vmem:[%s3176_s9 + $0x8] sm:$0xff]  ;;  %v1835_v28 = vld [vmem:[%s3176_s9 + $0x18] sm:$0xff]  ;;  %3203 = vst [vmem:[#allocation7_spill] sm:$0xff] %v2478_v35  ;;  %v430_v38 = vrot.slane %v391_v34, %v429_v31  ;;  %v550_v39 = vrot.slane %v391_v34, %v549_v32  ;;  %v702_v40 = vrot.slane %v391_v34, %v701_v33  ;;  %v426_v44 = vrot.slane %v391_v34, %v2478_v35  ;;  %v393_v50 = vld [vmem:[%s387_s23 + $0x10] sm:$0x77]  ;;  %s2038_s18 = scalar_lea.sflag [#allocation4], %s380_s26 }
  0x21   : > { %v392_v36 = vld [vmem:[%s387_s23 + $0x8] sm:$0x77]  ;;  %v546_v46 = vrot.slane %v391_v34, %v545_v37  ;;  %v394_v51 = vld [vmem:[%s387_s23 + $0x18] sm:$0x77]  ;;  %v698_v56 = vrot.slane %v391_v34, %v697_v45  ;;  %v446_v61 = vrot.slane %v393_v50, %v429_v31  ;;  %v566_v62 = vrot.slane %v393_v50, %v549_v32  ;;  %s2211_s10 = scalar_lea.vmem %s3127_s14, 128  ;;  %s2279_s23 = smov [#allocation3]  }
  0x22   : > { %2202 = vset.pattern.permute.xlu0 %v3179_v6  ;;  %2199 = vset.pattern.permute.xlu1 %v2275_v2  ;;  %v438_v41 = vrot.slane %v392_v36, %v429_v31  ;;  %v558_v42 = vrot.slane %v392_v36, %v549_v32  ;;  %v710_v43 = vrot.slane %v392_v36, %v701_v33  ;;  %p2212_p11 = scmp.ne.s32.totalorder %s3127_s14, %s2211_s10  ;;  %s2215_s25 = sshll.u32 %s2279_s23, 4  ;;  %s2216_s25 = int_to_ptr.vmem [resolvable:$false] %s2215_s25 }
  0x23   : > { %401 = vperm.xlu0 %2202, %v395_v1   ;;  %684 = vperm.xlu1 %2199, %v396_v5   ;;  %v2484_v47 = vrot.slane %v430_v38, %v2478_v35  ;;  %v2486_v48 = vrot.slane %v550_v39, %v545_v37  ;;  %v2488_v49 = vrot.slane %v702_v40, %v697_v45  ;;  %s2217_s30 = scalar_lea.vmem %s2216_s25, 256  ;;  %p2218_p0 = scmp.lt.s32.totalorder %s3127_s14, %s2216_s25 }
  0x24   : > { %v2491_v52 = vrot.slane %v438_v41, %v2478_v35  ;;  %v2493_v53 = vrot.slane %v558_v42, %v545_v37  ;;  %v2495_v54 = vrot.slane %v710_v43, %v697_v45  ;;  %v2498_v55 = vrot.slane %v426_v44, %v2478_v35  ;;  %p2213_p12 = pnand %p2212_p11, %p2381_p5  ;;  %p2219_p1 = scmp.lt.s32.totalorder %s2217_s30, %s2211_s10 }
  0x25   : > { %v434_v57 = vrot.slane %v392_v36, %v2478_v35  ;;  %v554_v58 = vrot.slane %v392_v36, %v545_v37  ;;  %v706_v59 = vrot.slane %v392_v36, %v697_v45  ;;  %v2501_v60 = vrot.slane %v546_v46, %v545_v37 }
  0x26   : > { %v574_v63 = vrot.slane %v394_v51, %v549_v32  ;;  %v718_v0 = vrot.slane %v393_v50, %v701_v33  ;;  %v454_v1 = vrot.slane %v394_v51, %v429_v31  ;;  %p2214_p13 = pneg %p2213_p12  ;;  %p2220_p2 = por %p2219_p1, %p2218_p0 }
  0x27   : > { %406 = vperm.xlu0 %2202, %v396_v5   ;;  %2200 = vset.pattern.permute.xlu1 %v3179_v6  ;;  %v714_v5 = vrot.slane %v393_v50, %v697_v45 }
  0x28   : > { %411 = vperm.xlu1 %2200, %v397_v4   ;;  %p2221_p3 = pnand %p2220_p2, %p2214_p13 }
  0x2b   : > { %416 = vperm.xlu0 %2202, %v398_v7  }
  0x2c   : > { %2201 = vset.pattern.permute.xlu1 %v2276_v3  ;;  %v562_v3 = vrot.slane %v393_v50, %v545_v37 }
  0x2d   : > { %536 = vperm.xlu1 %2201, %v397_v4   ;;  %v442_v4 = vrot.slane %v393_v50, %v2478_v35 }
  0x2f   : > { %842 = vperm.xlu0 %2202, %v832_v8   ;;  %v570_v8 = vrot.slane %v394_v51, %v545_v37 }
  0x31   : > { %540 = vperm.xlu1 %2201, %v398_v7  }
  0x33   : > { %945 = vperm.xlu0 %2202, %v939_v9   ;;  %v2505_v9 = vrot.slane %v698_v56, %v697_v45 }
  0x35   : > { %2203 = vset.pattern.permute.xlu1 %v2275_v2  ;;  %v726_v2 = vrot.slane %v394_v51, %v701_v33 }
  0x36   : > { %692 = vperm.xlu1 %2203, %v398_v7   ;;  %v450_v7 = vrot.slane %v394_v51, %v2478_v35 }
  0x37   : > { %955 = vperm.xlu0 %2202, %v941_v10   ;;  %v2508_v10 = vrot.slane %v434_v57, %v2478_v35 }
  0x3a   : > { %2204 = vset.pattern.permute.xlu1 %v3179_v6 }
  0x3b   : > { %1250 = vperm.xlu0 %2202, %v1244_v11   ;;  %837 = vperm.xlu1 %2204, %v831_v12   ;;  %v2510_v11 = vrot.slane %v554_v58, %v545_v37  ;;  %v722_v12 = vrot.slane %v394_v51, %v697_v45 }
  0x3d   : > { %v2543_v31 = vrot.slane %v722_v12, %v697_v45 }
  0x3f   : > { %1260 = vperm.xlu0 %2202, %v1246_v13   ;;  %847 = vperm.xlu1 %2204, %v833_v14   ;;  %v2512_v13 = vrot.slane %v706_v59, %v697_v45  ;;  %v2515_v14 = vrot.slane %v446_v61, %v2478_v35 }
  0x43   : > { %1554 = vperm.xlu0 %2202, %v1548_v15   ;;  %852 = vperm.xlu1 %2204, %v834_v16   ;;  %v2517_v15 = vrot.slane %v566_v62, %v545_v37  ;;  %v2519_v16 = vrot.slane %v574_v63, %v545_v37 }
  0x45   : > { %3204 = vst [vmem:[#allocation8_spill] sm:$0xff] %v2517_v15  ;;  %3205 = vst [vmem:[#allocation9_spill] sm:$0xff] %v2519_v16 }
  0x47   : > { %1564 = vperm.xlu0 %2202, %v1550_v17   ;;  %950 = vperm.xlu1 %2204, %v940_v18  }
  0x4b   : > { %1838 = vperm.xlu0 %2202, %v1832_v19   ;;  %960 = vperm.xlu1 %2204, %v942_v20   ;;  %v2521_v19 = vrot.slane %v718_v0, %v697_v45  ;;  %v2524_v20 = vrot.slane %v454_v1, %v2478_v35 }
  0x4d   : > { %3206 = vst [vmem:[#allocation10_spill] sm:$0xff] %v2521_v19  ;;  %3207 = vst [vmem:[#allocation11_spill] sm:$0xff] %v2524_v20 }
  0x4f   : > { %1848 = vperm.xlu0 %2202, %v1834_v21   ;;  %1255 = vperm.xlu1 %2204, %v1245_v22   ;;  %v2526_v21 = vrot.slane %v726_v2, %v697_v45  ;;  %v2528_v22 = vrot.slane %v562_v3, %v545_v37 }
  0x51   : > { %3208 = vst [vmem:[#allocation12_spill] sm:$0xff] %v2526_v21  ;;  %3209 = vst [vmem:[#allocation13_spill] sm:$0xff] %v2528_v22 }
  0x53   : > { %1963 = vperm.xlu0 %2202, %v1960_v23   ;;  %1265 = vperm.xlu1 %2204, %v1247_v24   ;;  %v2531_v23 = vrot.slane %v442_v4, %v2478_v35  ;;  %v2533_v24 = vrot.slane %v714_v5, %v697_v45 }
  0x57   : > { %1559 = vperm.xlu1 %2204, %v1549_v25   ;;  %v2536_v25 = vrot.slane %v450_v7, %v2478_v35 }
  0x5b   : > { %1569 = vperm.xlu1 %2204, %v1551_v26   ;;  %v2538_v26 = vrot.slane %v570_v8, %v545_v37 }
  0x5d   : > { %3210 = vst [vmem:[#allocation14_spill] sm:$0xff] %v2538_v26 }
  0x5f   : > { %1843 = vperm.xlu1 %2204, %v1833_v27  }
  0x63   : > { %1853 = vperm.xlu1 %2204, %v1835_v28  }
  0x99   : > { %v529_v17 = vpop.permute.xlu1 %528  ;;  %v681_v18 = vpop.permute.xlu0 %680 }
  0x9a   : > { %v616_v27 = vmul.f32 %v2486_v48, %v529_v17  ;;  %v768_v28 = vmul.f32 %v2488_v49, %v681_v18  ;;  %v618_v29 = vmul.f32 %v2493_v53, %v529_v17  ;;  %v770_v32 = vmul.f32 %v2495_v54, %v681_v18 }
  0x9b   : > { %v615_v33 = vmul.f32 %v2501_v60, %v529_v17  ;;  %v767_v34 = vmul.f32 %v2505_v9, %v681_v18  ;;  %v617_v36 = vmul.f32 %v2510_v11, %v529_v17  ;;  %v769_v37 = vmul.f32 %v2512_v13, %v681_v18 }
  0x9c   : > { %v2553_v40 = vmul.f32 %v2517_v15, %v529_v17  ;;  %v2556_v41 = vmul.f32 %v2521_v19, %v681_v18  ;;  %v2559_v42 = vmul.f32 %v2519_v16, %v529_v17  ;;  %v2562_v43 = vmul.f32 %v2526_v21, %v681_v18 }
  0x9d   : > { %v533_v38 = vpop.permute.xlu1 %532  ;;  %v2549_v39 = vpop.permute.xlu0 %688  ;;  %v2565_v44 = vmul.f32 %v2528_v22, %v529_v17  ;;  %v2568_v45 = vmul.f32 %v2533_v24, %v681_v18  ;;  %v2571_v46 = vmul.f32 %v2538_v26, %v529_v17  ;;  %v2577_v57 = vmul.f32 %v2543_v31, %v681_v18 }
  0x9e   : > { %3211 = vst [vmem:[#allocation15_spill] sm:$0xff] %v2549_v39  ;;  %v624_v50 = vmul.f32 %v2486_v48, %v533_v38  ;;  %v626_v51 = vmul.f32 %v2493_v53, %v533_v38  ;;  %v623_v56 = vmul.f32 %v2501_v60, %v533_v38  ;;  %v625_v58 = vmul.f32 %v2510_v11, %v533_v38 }
  0x9f   : > { %3212 = vst [vmem:[#allocation16_spill] sm:$0xff] %v2568_v45  ;;  %3213 = vst [vmem:[#allocation17_spill] sm:$0xff] %v2571_v46  ;;  %v2582_v59 = vmul.f32 %v2488_v49, %v2549_v39  ;;  %v2586_v61 = vmul.f32 %v2495_v54, %v2549_v39  ;;  %v2590_v62 = vmul.f32 %v2505_v9, %v2549_v39 }
  0xa0   : > { %3214 = vst [vmem:[#allocation18_spill] sm:$0xff] %v2577_v57  ;;  %v2594_v63 = vmul.f32 %v2512_v13, %v2549_v39  ;;  %v2597_v0 = vmul.f32 %v2517_v15, %v533_v38  ;;  %v2600_v1 = vmul.f32 %v2519_v16, %v533_v38  ;;  %v2603_v2 = vmul.f32 %v2528_v22, %v533_v38 }
  0xa1   : > { %v2610_v5 = vmul.f32 %v2538_v26, %v533_v38  ;;  %v2614_v7 = vmul.f32 %v2521_v19, %v2549_v39  ;;  %v2618_v8 = vmul.f32 %v2526_v21, %v2549_v39  ;;  %v2622_v12 = vmul.f32 %v2533_v24, %v2549_v39 }
  0xa2   : > { %v2605_v3 = vpop.permute.xlu0 %401  ;;  %v2607_v4 = vpop.permute.xlu1 %684 }
  0xa3   : > { %3215 = vst [vmem:[#allocation19_spill] sm:$0xff] %v2610_v5  ;;  %3216 = vst [vmem:[#allocation20_spill] sm:$0xff] %v2614_v7  ;;  %v496_v17 = vmul.f32 %v2484_v47, %v2605_v3  ;;  %v776_v18 = vmul.f32 %v2488_v49, %v2607_v4  ;;  %v498_v38 = vmul.f32 %v2491_v52, %v2605_v3 }
  0xa4   : > { %3217 = vst [vmem:[#allocation21_spill] sm:$0xff] %v2618_v8  ;;  %3218 = vst [vmem:[#allocation22_spill] sm:$0xff] %v2622_v12  ;;  %v778_v6 = vmul.f32 %v2495_v54, %v2607_v4  ;;  %v495_v30 = vmul.f32 %v2498_v55, %v2605_v3  ;;  %v775_v35 = vmul.f32 %v2505_v9, %v2607_v4 }
  0xa5   : > { %v497_v39 = vmul.f32 %v2508_v10, %v2605_v3  ;;  %v777_v26 = vmul.f32 %v2512_v13, %v2607_v4  ;;  %v648_v12 = vadd.f32 %v616_v27, %v496_v17  ;;  %v650_v8 = vadd.f32 %v618_v29, %v498_v38 }
  0xa6   : > { %v500_v22 = vmul.f32 %v2515_v14, %v2605_v3  ;;  %v2644_v7 = vmul.f32 %v2521_v19, %v2607_v4  ;;  %v2646_v16 = vpop.permute.xlu0 %406  ;;  %v647_v15 = vadd.f32 %v615_v33, %v495_v30  ;;  %v502_v5 = vmul.f32 %v2524_v20, %v2605_v3 }
  0xa7   : > { %v649_v57 = vadd.f32 %v617_v36, %v497_v39  ;;  %v2652_v46 = vmul.f32 %v2526_v21, %v2607_v4  ;;  %v2654_v27 = vpop.permute.xlu1 %411  ;;  %v504_v29 = vmul.f32 %v2484_v47, %v2646_v16  ;;  %v2658_v17 = vadd.f32 %v768_v28, %v648_v12 }
  0xa8   : > { %v506_v38 = vmul.f32 %v2491_v52, %v2646_v16  ;;  %v2662_v19 = vadd.f32 %v770_v32, %v650_v8  ;;  %v503_v30 = vmul.f32 %v2498_v55, %v2646_v16  ;;  %v2666_v33 = vadd.f32 %v767_v34, %v647_v15 }
  0xa9   : > { %v505_v36 = vmul.f32 %v2508_v10, %v2646_v16  ;;  %v2670_v39 = vadd.f32 %v769_v37, %v649_v57  ;;  %v656_v21 = vadd.f32 %v624_v50, %v504_v29  ;;  %v512_v28 = vmul.f32 %v2484_v47, %v2654_v27 }
  0xaa   : > { %3219 = vst [vmem:[#allocation23_spill] sm:$0xff] %v2662_v19  ;;  %v658_v45 = vadd.f32 %v626_v51, %v506_v38  ;;  %v514_v12 = vmul.f32 %v2491_v52, %v2654_v27  ;;  %v2676_v32 = vpop.permute.xlu0 %416  ;;  %v655_v8 = vadd.f32 %v623_v56, %v503_v30  ;;  %v511_v15 = vmul.f32 %v2498_v55, %v2654_v27 }
  0xab   : > { %3220 = vst [vmem:[#allocation24_spill] sm:$0xff] %v2670_v39  ;;  %3221 = vst [vmem:[#allocation25_spill] sm:$0xff] %v2676_v32  ;;  %v657_v19 = vadd.f32 %v625_v58, %v505_v36  ;;  %v513_v34 = vmul.f32 %v2508_v10, %v2654_v27  ;;  %v808_v37 = vadd.f32 %v776_v18, %v656_v21 }
  0xac   : > { %v810_v57 = vadd.f32 %v778_v6, %v658_v45  ;;  %v520_v50 = vmul.f32 %v2484_v47, %v2676_v32  ;;  %v522_v51 = vmul.f32 %v2491_v52, %v2676_v32  ;;  %v2686_v29 = vpop.permute.xlu1 %536  ;;  %v807_v38 = vadd.f32 %v775_v35, %v655_v8 }
  0xad   : > { %3222 = vst [vmem:[#allocation26_spill] sm:$0xff] %v2686_v29  ;;  %v809_v39 = vadd.f32 %v777_v26, %v657_v19  ;;  %v519_v56 = vmul.f32 %v2498_v55, %v2676_v32  ;;  %v521_v58 = vmul.f32 %v2508_v10, %v2676_v32  ;;  %v632_v21 = vmul.f32 %v2486_v48, %v2686_v29 }
  0xae   : > { %v634_v6 = vmul.f32 %v2493_v53, %v2686_v29  ;;  %v631_v47 = vmul.f32 %v2501_v60, %v2686_v29  ;;  %v633_v52 = vmul.f32 %v2510_v11, %v2686_v29  ;;  %v2700_v35 = vpop.permute.xlu0 %842  ;;  %v508_v55 = vmul.f32 %v2515_v14, %v2646_v16 }
  0xaf   : > { %v652_v19 = vadd.f32 %v2553_v40, %v500_v22  ;;  %v510_v10 = vmul.f32 %v2524_v20, %v2646_v16  ;;  %v654_v26 = vadd.f32 %v2559_v42, %v502_v5  ;;  %v2709_v45 = vadd.f32 %v2700_v35, %v808_v37 }
  0xb0   : > { %v2712_v18 = vadd.f32 %v2700_v35, %v810_v57  ;;  %v2715_v30 = vadd.f32 %v2700_v35, %v807_v38  ;;  %v2718_v36 = vadd.f32 %v2700_v35, %v809_v39  ;;  %v2720_v8 = vpop.permute.xlu1 %540  ;;  %v664_v22 = vadd.f32 %v632_v21, %v512_v28 }
  0xb1   : > { %v666_v40 = vadd.f32 %v634_v6, %v514_v12  ;;  %v663_v29 = vadd.f32 %v631_v47, %v511_v15  ;;  %v665_v20 = vadd.f32 %v633_v52, %v513_v34  ;;  %v896_v42 = vmax.f32 %v2709_v45, 0.0 }
  0xb2   : > { %v898_v5 = vmax.f32 %v2712_v18, 0.0  ;;  %v895_v37 = vmax.f32 %v2715_v30, 0.0  ;;  %v897_v57 = vmax.f32 %v2718_v36, 0.0  ;;  %v640_v38 = vmul.f32 %v2486_v48, %v2720_v8 }
  0xb3   : > { %v816_v39 = vadd.f32 %v2582_v59, %v664_v22  ;;  %v642_v32 = vmul.f32 %v2493_v53, %v2720_v8  ;;  %v818_v28 = vadd.f32 %v2586_v61, %v666_v40  ;;  %v639_v12 = vmul.f32 %v2501_v60, %v2720_v8 }
  0xb4   : > { %v815_v15 = vadd.f32 %v2590_v62, %v663_v29  ;;  %v641_v34 = vmul.f32 %v2510_v11, %v2720_v8  ;;  %v817_v21 = vadd.f32 %v2594_v63, %v665_v20  ;;  %v672_v6 = vadd.f32 %v640_v38, %v520_v50 }
  0xb5   : > { %v674_v47 = vadd.f32 %v642_v32, %v522_v51  ;;  %v660_v48 = vadd.f32 %v2597_v0, %v508_v55  ;;  %v804_v59 = vadd.f32 %v2556_v41, %v652_v19  ;;  %v2740_v52 = vpop.permute.xlu1 %692  ;;  %v671_v53 = vadd.f32 %v639_v12, %v519_v56 }
  0xb6   : > { %v673_v61 = vadd.f32 %v641_v34, %v521_v58  ;;  %v662_v45 = vadd.f32 %v2600_v1, %v510_v10  ;;  %v806_v60 = vadd.f32 %v2562_v43, %v654_v26  ;;  %v792_v62 = vmul.f32 %v2488_v49, %v2740_v52  ;;  %v3224_v26 = vld [vmem:[#allocation24_spill] sm:$0xff] }
  0xb7   : > { %v794_v11 = vmul.f32 %v2495_v54, %v2740_v52  ;;  %v791_v20 = vmul.f32 %v2505_v9, %v2740_v52  ;;  %v793_v41 = vmul.f32 %v2512_v13, %v2740_v52  ;;  %v812_v63 = vadd.f32 %v2644_v7, %v660_v48 }
  0xb8   : > { %v814_v0 = vadd.f32 %v2652_v46, %v662_v45  ;;  %v499_v1 = vmul.f32 %v2531_v23, %v2605_v3  ;;  %v507_v43 = vmul.f32 %v2531_v23, %v2646_v16  ;;  %v824_v49 = vadd.f32 %v792_v62, %v672_v6  ;;  %v3225_v6 = vld [vmem:[#allocation16_spill] sm:$0xff] }
  0xb9   : > { %v826_v32 = vadd.f32 %v794_v11, %v674_v47  ;;  %v823_v50 = vadd.f32 %v791_v20, %v671_v53  ;;  %v825_v54 = vadd.f32 %v793_v41, %v673_v61  ;;  %v868_v51 = vadd.f32 %v2700_v35, %v812_v63 }
  0xba   : > { %v870_v9 = vadd.f32 %v2700_v35, %v814_v0  ;;  %v651_v13 = vadd.f32 %v2565_v44, %v499_v1  ;;  %v659_v7 = vadd.f32 %v2603_v2, %v507_v43  ;;  %v2762_v29 = vpop.permute.xlu1 %837  ;;  %v779_v46 = vmul.f32 %v2533_v24, %v2607_v4  ;;  %v3223_v44 = vld [vmem:[#allocation23_spill] sm:$0xff] }
  0xbb   : > { %v501_v56 = vmul.f32 %v2536_v25, %v2605_v3  ;;  %v509_v58 = vmul.f32 %v2536_v25, %v2646_v16  ;;  %v781_v55 = vmul.f32 %v2543_v31, %v2607_v4  ;;  %v856_v19 = vadd.f32 %v2762_v29, %v2658_v17 }
  0xbc   : > { %v858_v2 = vadd.f32 %v2762_v29, %v3223_v44  ;;  %v855_v10 = vadd.f32 %v2762_v29, %v2666_v33  ;;  %v857_v18 = vadd.f32 %v2762_v29, %v3224_v26  ;;  %v860_v3 = vadd.f32 %v2762_v29, %v804_v59  ;;  %v3228_v26 = vld [vmem:[#allocation18_spill] sm:$0xff] }
  0xbd   : > { %v900_v30 = vmax.f32 %v868_v51, 0.0  ;;  %v862_v16 = vadd.f32 %v2762_v29, %v806_v60  ;;  %v902_v36 = vmax.f32 %v870_v9, 0.0  ;;  %v888_v22 = vmax.f32 %v856_v19, 0.0  ;;  %v3226_v51 = vld [vmem:[#allocation17_spill] sm:$0xff] }
  0xbe   : > { %v890_v4 = vmax.f32 %v858_v2, 0.0  ;;  %v887_v40 = vmax.f32 %v855_v10, 0.0  ;;  %v889_v38 = vmax.f32 %v857_v18, 0.0  ;;  %v2782_v17 = vpop.permute.xlu1 %847  ;;  %v892_v12 = vmax.f32 %v860_v3, 0.0 }
  0xbf   : > { %v894_v34 = vmax.f32 %v862_v16, 0.0  ;;  %v803_v47 = vadd.f32 %v3225_v6, %v651_v13  ;;  %v811_v33 = vadd.f32 %v779_v46, %v659_v7  ;;  %v924_v48 = vpack.c.bf16 %v896_v42, %v888_v22  ;;  %v3227_v13 = vld [vmem:[#allocation19_spill] sm:$0xff] }
  0xc0   : > { %v926_v53 = vpack.c.bf16 %v898_v5, %v890_v4  ;;  %v923_v61 = vpack.c.bf16 %v895_v37, %v887_v40  ;;  %v925_v45 = vpack.c.bf16 %v897_v57, %v889_v38  ;;  %v872_v59 = vadd.f32 %v2782_v17, %v816_v39  ;;  %v3230_v4 = vld [vmem:[#allocation26_spill] sm:$0xff]  ;;  %v3231_v40 = vld [vmem:[#allocation8_spill] sm:$0xff]  ;;  %v3233_v6 = vld [vmem:[#allocation11_spill] sm:$0xff] }
  0xc1   : > { %v874_v60 = vadd.f32 %v2782_v17, %v818_v28  ;;  %v871_v62 = vadd.f32 %v2782_v17, %v815_v15  ;;  %v873_v11 = vadd.f32 %v2782_v17, %v817_v21  ;;  %980 = vmatprep.subr.bf16.mxu0 %v924_v48  ;;  %v928_v20 = vpack.c.bf16 %v900_v30, %v892_v12 }
  0xc2   : > { %1033 = vmatprep.subr.bf16.mxu1 %v926_v53  ;;  %v930_v41 = vpack.c.bf16 %v902_v36, %v894_v34  ;;  %v859_v63 = vadd.f32 %v2762_v29, %v803_v47  ;;  %v2790_v0 = vpop.permute.xlu1 %852  ;;  %981 = vmatpush1.bf16.msra.mxu0 %v923_v61  ;;  %v904_v42 = vmax.f32 %v872_v59, 0.0  ;;  %v867_v1 = vadd.f32 %v2700_v35, %v811_v33  ;;  %v3229_v36 = vld [vmem:[#allocation25_spill] sm:$0xff] }
  0xc3   : > { %1034 = vmatpush1.bf16.msra.mxu1 %v925_v45  ;;  %v906_v5 = vmax.f32 %v874_v60, 0.0  ;;  %v903_v37 = vmax.f32 %v871_v62, 0.0  ;;  %v905_v57 = vmax.f32 %v873_v11, 0.0  ;;  %v880_v39 = vadd.f32 %v2790_v0, %v824_v49  ;;  %v3234_v61 = vld [vmem:[#allocation9_spill] sm:$0xff]  ;;  %v3235_v62 = vld [vmem:[#allocation12_spill] sm:$0xff] }
  0xc4   : > { %v882_v28 = vadd.f32 %v2790_v0, %v826_v32  ;;  %v879_v15 = vadd.f32 %v2790_v0, %v823_v50  ;;  %v881_v21 = vadd.f32 %v2790_v0, %v825_v54  ;;  %v891_v43 = vmax.f32 %v859_v63, 0.0 }
  0xc5   : > { %v653_v9 = vadd.f32 %v3226_v51, %v501_v56  ;;  %v661_v7 = vadd.f32 %v3227_v13, %v509_v58  ;;  %v912_v46 = vmax.f32 %v880_v39, 0.0  ;;  %v899_v10 = vmax.f32 %v867_v1, 0.0  ;;  %v3237_v39 = vld [vmem:[#allocation13_spill] sm:$0xff] }
  0xc6   : > { %v914_v19 = vmax.f32 %v882_v28, 0.0  ;;  %v911_v44 = vmax.f32 %v879_v15, 0.0  ;;  %v913_v2 = vmax.f32 %v881_v21, 0.0  ;;  %v516_v32 = vmul.f32 %v2515_v14, %v2654_v27  ;;  %v3238_v1 = vld [vmem:[#allocation21_spill] sm:$0xff] }
  0xc7   : > { %v805_v49 = vadd.f32 %v3228_v26, %v653_v9  ;;  %v813_v18 = vadd.f32 %v781_v55, %v661_v7  ;;  %v932_v50 = vpack.c.bf16 %v912_v46, %v904_v42  ;;  %v927_v16 = vpack.c.bf16 %v899_v10, %v891_v43  ;;  %v2809_v55 = vld [vmem:[%s3170_s3] sm:$0xff]   ;;  %v2206_v26 = vld [vmem:[%s3170_s3 + $0x8] sm:$0xff]  }
  0xc8   : > { %v934_v54 = vpack.c.bf16 %v914_v19, %v906_v5  ;;  %v931_v3 = vpack.c.bf16 %v911_v44, %v903_v37  ;;  %v933_v30 = vpack.c.bf16 %v913_v2, %v905_v57  ;;  %v524_v22 = vmul.f32 %v2515_v14, %v3229_v36 }
  0xc9   : > { %v861_v56 = vadd.f32 %v2762_v29, %v805_v49  ;;  %v869_v58 = vadd.f32 %v2700_v35, %v813_v18  ;;  %982 = vmatprep.subr.bf16.mxu0 %v932_v50  ;;  %v636_v38 = vmul.f32 %v3231_v40, %v3230_v4  ;;  %v644_v12 = vmul.f32 %v3231_v40, %v2720_v8  ;;  %v3232_v29 = vld [vmem:[#allocation10_spill] sm:$0xff] }
  0xca   : > { %1035 = vmatprep.subr.bf16.mxu1 %v934_v54  ;;  %v796_v35 = vmul.f32 %v3232_v29, %v2740_v52  ;;  %983 = vmatpush1.bf16.msra.mxu0 %v931_v3  ;;  %v518_v47 = vmul.f32 %v3233_v6, %v2654_v27  ;;  %v526_v33 = vmul.f32 %v3233_v6, %v3229_v36  ;;  %v3239_v9 = vmov 0   ;;  %v3240_v18 = vld [vmem:[#allocation22_spill] sm:$0xff] }
  0xcb   : > { %1036 = vmatpush1.bf16.msra.mxu1 %v933_v30  ;;  %v893_v14 = vmax.f32 %v861_v56, 0.0  ;;  %v901_v34 = vmax.f32 %v869_v58, 0.0  ;;  %1086 = vmatprep.subr.bf16.mxu0 %v928_v20  ;;  %v668_v48 = vadd.f32 %v636_v38, %v516_v32  ;;  %v676_v53 = vadd.f32 %v644_v12, %v524_v22  ;;  %v3236_v20 = vld [vmem:[#allocation20_spill] sm:$0xff] }
  0xcc   : > { %1139 = vmatprep.subr.bf16.mxu1 %v930_v41  ;;  %v638_v45 = vmul.f32 %v3234_v61, %v3230_v4  ;;  %v646_v60 = vmul.f32 %v3234_v61, %v2720_v8  ;;  %v798_v11 = vmul.f32 %v3235_v62, %v2740_v52  ;;  %v515_v63 = vmul.f32 %v2531_v23, %v2654_v27 }
  0xcd   : > { %v929_v59 = vpack.c.bf16 %v901_v34, %v893_v14  ;;  %2120 = vmatmul.mubr.msk.bf16.vlgmr.msra.gmra.mrb[0].mxu0 %vm973_vm0, %v2809_v55  ;;  %v820_v41 = vadd.f32 %v3236_v20, %v668_v48  ;;  %v828_v42 = vadd.f32 %v796_v35, %v676_v53  ;;  %v523_v57 = vmul.f32 %v2531_v23, %v3229_v36 }
  0xce   : > { %2122 = vmatmul.mubr.msk.bf16.vlgmr.msra.gmra.mrb[0].mxu1 %vm973_vm0, %v2809_v55  ;;  %v670_v5 = vadd.f32 %v638_v45, %v518_v47  ;;  %1087 = vmatpush1.bf16.msra.mxu0 %v927_v16  ;;  %v678_v37 = vadd.f32 %v646_v60, %v526_v33  ;;  %v635_v28 = vmul.f32 %v3237_v39, %v3230_v4  ;;  %v3242_v16 = vld [vmem:[#allocation15_spill] sm:$0xff] }
  0xcf   : > { %1140 = vmatpush1.bf16.msra.mxu1 %v929_v59  ;;  %v876_v15 = vadd.f32 %v2782_v17, %v820_v41  ;;  %v884_v21 = vadd.f32 %v2790_v0, %v828_v42  ;;  %v643_v51 = vmul.f32 %v3237_v39, %v2720_v8  ;;  %1022 = vmatprep.mubr.bf16.mxu0 %v3239_v9 }
  0xd0   : > { %v822_v43 = vadd.f32 %v3238_v1, %v670_v5  ;;  %v830_v13 = vadd.f32 %v798_v11, %v678_v37  ;;  %v667_v7 = vadd.f32 %v635_v28, %v515_v63  ;;  %v795_v46 = vmul.f32 %v2533_v24, %v2740_v52  ;;  %1075 = vmatprep.mubr.bf16.mxu1 %v3239_v9 }
  0xd1   : > { %v517_v23 = vmul.f32 %v2536_v25, %v2654_v27  ;;  %v908_v19 = vmax.f32 %v876_v15, 0.0  ;;  %v916_v44 = vmax.f32 %v884_v21, 0.0  ;;  %v675_v10 = vadd.f32 %v643_v51, %v523_v57  ;;  %v3241_v27 = vld [vmem:[#allocation14_spill] sm:$0xff] }
  0xd2   : > { %v878_v2 = vadd.f32 %v2782_v17, %v822_v43  ;;  %v886_v49 = vadd.f32 %v2790_v0, %v830_v13  ;;  %v819_v32 = vadd.f32 %v3240_v18, %v667_v7  ;;  %v525_v24 = vmul.f32 %v2536_v25, %v3229_v36 }
  0xd3   : > { %v637_v50 = vmul.f32 %v3241_v27, %v3230_v4  ;;  %v936_v54 = vpack.c.bf16 %v916_v44, %v908_v19  ;;  %v827_v30 = vadd.f32 %v795_v46, %v675_v10  ;;  %v789_v56 = vmul.f32 %v2543_v31, %v3242_v16 }
  0xd4   : > { %v910_v3 = vmax.f32 %v878_v2, 0.0  ;;  %v918_v58 = vmax.f32 %v886_v49, 0.0  ;;  %v875_v22 = vadd.f32 %v2782_v17, %v819_v32  ;;  %v645_v40 = vmul.f32 %v3241_v27, %v2720_v8 }
  0xd5   : > { %v669_v38 = vadd.f32 %v637_v50, %v517_v23  ;;  %1088 = vmatprep.subr.bf16.mxu0 %v936_v54  ;;  %v883_v12 = vadd.f32 %v2790_v0, %v827_v30  ;;  %v797_v25 = vmul.f32 %v2543_v31, %v2740_v52  ;;  %2121 = vmatmul.mubr.msk.bf16.gmra.mrb[4].mxu0 %vm973_vm0, %v2206_v26 }
  0xd6   : > { %v938_v36 = vpack.c.bf16 %v918_v58, %v910_v3  ;;  %v677_v4 = vadd.f32 %v645_v40, %v525_v24  ;;  %2123 = vmatmul.mubr.msk.bf16.gmra.mrb[4].mxu1 %vm973_vm0, %v2206_v26  ;;  %1118 = vmatprep.mubr.bf16.mxu0 %v3239_v9  ;;  %v907_v35 = vmax.f32 %v875_v22, 0.0 }
  0xd7   : > { %v821_v29 = vadd.f32 %v789_v56, %v669_v38  ;;  %v915_v14 = vmax.f32 %v883_v12, 0.0  ;;  %1171 = vmatprep.mubr.bf16.mxu1 %v3239_v9 }
  0xd8   : > { %1141 = vmatprep.subr.bf16.mxu1 %v938_v36  ;;  %v829_v8 = vadd.f32 %v797_v25, %v677_v4 }
  0xd9   : > { %v877_v34 = vadd.f32 %v2782_v17, %v821_v29  ;;  %v935_v6 = vpack.c.bf16 %v915_v14, %v907_v35  ;;  %v2883_v17 = vpop.permute.xlu0 %945 }
  0xda   : > { %v885_v31 = vadd.f32 %v2790_v0, %v829_v8  ;;  %v2885_v0 = vpop.permute.xlu1 %950 }
  0xdb   : > { %1089 = vmatpush1.bf16.msra.mxu0 %v935_v6  ;;  %v909_v52 = vmax.f32 %v877_v34, 0.0 }
  0xdc   : > { %v917_v47 = vmax.f32 %v885_v31, 0.0 }
  0xdd   : > { %v2895_v7 = vpop.permute.xlu0 %955 }
  0xde   : > { %v937_v33 = vpack.c.bf16 %v917_v47, %v909_v52  ;;  %2124 = vmatmul.mubr.msk.bf16.vlgmr.msra.gmra.mrb[8].mxu0 %vm973_vm0, %v2809_v55  ;;  %v2897_v19 = vpop.permute.xlu1 %960 }
  0xdf   : > { %1128 = vmatprep.mubr.bf16.mxu0 %v3239_v9 }
  0xe0   : > { %1142 = vmatpush1.bf16.msra.mxu1 %v937_v33 }
  0xe3   : > { %2126 = vmatmul.mubr.msk.bf16.vlgmr.msra.gmra.mrb[8].mxu1 %vm973_vm0, %v2809_v55 }
  0xe4   : > { %1181 = vmatprep.mubr.bf16.mxu1 %v3239_v9 }
  0xe6   : > { %2125 = vmatmul.mubr.msk.bf16.gmra.mrb[12].mxu0 %vm973_vm0, %v2206_v26 }
  0xe7   : > { %1316 = vmatprep.mubr.bf16.mxu0 %v3239_v9 }
  0xeb   : > { %2127 = vmatmul.mubr.msk.bf16.gmra.mrb[12].mxu1 %vm973_vm0, %v2206_v26 }
  0xec   : > { %1369 = vmatprep.mubr.bf16.mxu1 %v3239_v9 }
 0x1a0   : > { %v1014_v48 = vpop.f32.mrb[0].mxu0 }
 0x1a1   : > { %v1067_v53 = vpop.f32.mrb[0].mxu1  ;;  %v1015_v61 = vadd.f32 %v1014_v48, %v2883_v17  ;;  %v1016_v45 = vpop.f32.mrb[1].mxu0  ;;  %v2911_v48 = vld [vmem:[%s3172_s5] sm:$0xff]  }
 0x1a2   : > { %v1068_v55 = vadd.f32 %v1067_v53, %v2883_v17  ;;  %v1069_v59 = vpop.f32.mrb[1].mxu1  ;;  %v1017_v60 = vadd.f32 %v1016_v45, %v2883_v17  ;;  %v1018_v11 = vpop.f32.mrb[2].mxu0 }
 0x1a3   : > { %v1070_v62 = vadd.f32 %v1069_v59, %v2883_v17  ;;  %v1071_v63 = vpop.f32.mrb[2].mxu1  ;;  %v1019_v20 = vadd.f32 %v1018_v11, %v2885_v0  ;;  %v1020_v42 = vpop.f32.mrb[3].mxu0  ;;  %v1192_v39 = vmax.f32 %v1015_v61, 0.0 }
 0x1a4   : > { %v1072_v41 = vadd.f32 %v1071_v63, %v2885_v0  ;;  %v1073_v5 = vpop.f32.mrb[3].mxu1  ;;  %v1021_v37 = vadd.f32 %v1020_v42, %v2885_v0  ;;  %v1194_v28 = vmax.f32 %v1068_v55, 0.0  ;;  %v1193_v1 = vmax.f32 %v1017_v60, 0.0 }
 0x1a5   : > { %v1074_v57 = vadd.f32 %v1073_v5, %v2885_v0  ;;  %v1200_v15 = vmax.f32 %v1019_v20, 0.0  ;;  %v1195_v43 = vmax.f32 %v1070_v62, 0.0 }
 0x1a6   : > { %v1202_v21 = vmax.f32 %v1072_v41, 0.0  ;;  %v1201_v51 = vmax.f32 %v1021_v37, 0.0 }
 0x1a7   : > { %v1203_v13 = vmax.f32 %v1074_v57, 0.0  ;;  %v1228_v46 = vpack.c.bf16 %v1200_v15, %v1192_v39 }
 0x1a8   : > { %v1230_v23 = vpack.c.bf16 %v1202_v21, %v1194_v28  ;;  %v1229_v44 = vpack.c.bf16 %v1201_v51, %v1193_v1  ;;  %v1024_v10 = vpop.f32.mrb[4].mxu0 }
 0x1a9   : > { %v1231_v2 = vpack.c.bf16 %v1203_v13, %v1195_v43  ;;  %v1025_v26 = vadd.f32 %v1024_v10, %v2895_v7  ;;  %v1077_v49 = vpop.f32.mrb[4].mxu1  ;;  %v1026_v18 = vpop.f32.mrb[5].mxu0  ;;  %v2208_v13 = vld [vmem:[%s3172_s5 + $0x8] sm:$0xff]  }
 0x1aa   : > { %v1078_v32 = vadd.f32 %v1077_v49, %v2895_v7  ;;  %v1027_v24 = vadd.f32 %v1026_v18, %v2895_v7  ;;  %v1079_v27 = vpop.f32.mrb[5].mxu1  ;;  %v1028_v50 = vpop.f32.mrb[6].mxu0  ;;  %1284 = vmatprep.subr.bf16.mxu0 %v1229_v44 }
 0x1ab   : > { %1337 = vmatprep.subr.bf16.mxu1 %v1231_v2  ;;  %v1080_v54 = vadd.f32 %v1079_v27, %v2895_v7  ;;  %v1029_v3 = vadd.f32 %v1028_v50, %v2897_v19  ;;  %v1081_v30 = vpop.f32.mrb[6].mxu1  ;;  %v1030_v16 = vpop.f32.mrb[7].mxu0  ;;  %1285 = vmatpush1.bf16.msra.mxu0 %v1228_v46  ;;  %v1208_v40 = vmax.f32 %v1025_v26, 0.0 }
 0x1ac   : > { %1338 = vmatpush1.bf16.msra.mxu1 %v1230_v23  ;;  %v1082_v56 = vadd.f32 %v1081_v30, %v2897_v19  ;;  %v1031_v58 = vadd.f32 %v1030_v16, %v2897_v19  ;;  %v1083_v22 = vpop.f32.mrb[7].mxu1  ;;  %v1210_v25 = vmax.f32 %v1078_v32, 0.0  ;;  %v1209_v36 = vmax.f32 %v1027_v24, 0.0 }
 0x1ad   : > { %v1216_v38 = vmax.f32 %v1029_v3, 0.0  ;;  %v1084_v12 = vadd.f32 %v1083_v22, %v2897_v19  ;;  %v1211_v35 = vmax.f32 %v1080_v54, 0.0 }
 0x1ae   : > { %v1218_v4 = vmax.f32 %v1082_v56, 0.0  ;;  %v1217_v29 = vmax.f32 %v1031_v58, 0.0 }
 0x1af   : > { %v1236_v14 = vpack.c.bf16 %v1216_v38, %v1208_v40  ;;  %v1219_v8 = vmax.f32 %v1084_v12, 0.0 }
 0x1b0   : > { %v1238_v34 = vpack.c.bf16 %v1218_v4, %v1210_v25  ;;  %v1237_v6 = vpack.c.bf16 %v1217_v29, %v1209_v36 }
 0x1b1   : > { %v1239_v31 = vpack.c.bf16 %v1219_v8, %v1211_v35  ;;  %v1120_v52 = vpop.f32.mrb[8].mxu0  ;;  %v2953_v8 = vpop.permute.xlu1 %1255 }
 0x1b2   : > { %v1121_v47 = vadd.f32 %v1120_v52, %v2883_v17  ;;  %v1122_v33 = vpop.f32.mrb[9].mxu0  ;;  %1286 = vmatprep.subr.bf16.mxu0 %v1237_v6 }
 0x1b3   : > { %v1123_v53 = vadd.f32 %v1122_v33, %v2883_v17  ;;  %v1124_v61 = vpop.f32.mrb[10].mxu0  ;;  %1339 = vmatprep.subr.bf16.mxu1 %v1239_v31  ;;  %1287 = vmatpush1.bf16.msra.mxu0 %v1236_v14 }
 0x1b4   : > { %v1125_v55 = vadd.f32 %v1124_v61, %v2885_v0  ;;  %v1126_v45 = vpop.f32.mrb[11].mxu0  ;;  %1340 = vmatpush1.bf16.msra.mxu1 %v1238_v34  ;;  %v1196_v60 = vmax.f32 %v1121_v47, 0.0 }
 0x1b5   : > { %v1127_v59 = vadd.f32 %v1126_v45, %v2885_v0  ;;  %v1197_v20 = vmax.f32 %v1123_v53, 0.0 }
 0x1b6   : > { %v1173_v62 = vpop.f32.mrb[8].mxu1  ;;  %v1204_v11 = vmax.f32 %v1125_v55, 0.0  ;;  %2130 = vmatmul.mubr.msk.bf16.vlgmr.msra.gmra.mrb[16].mxu0 %vm973_vm0, %v2911_v48 }
 0x1b7   : > { %v1174_v63 = vadd.f32 %v1173_v62, %v2883_v17  ;;  %v1175_v41 = vpop.f32.mrb[9].mxu1  ;;  %v1205_v42 = vmax.f32 %v1127_v59, 0.0  ;;  %2132 = vmatmul.mubr.msk.bf16.vlgmr.msra.gmra.mrb[16].mxu1 %vm973_vm0, %v2911_v48  ;;  %1326 = vmatprep.mubr.bf16.mxu0 %v3239_v9 }
 0x1b8   : > { %v1176_v5 = vadd.f32 %v1175_v41, %v2883_v17  ;;  %v1232_v37 = vpack.c.bf16 %v1204_v11, %v1196_v60  ;;  %v1177_v57 = vpop.f32.mrb[10].mxu1  ;;  %1379 = vmatprep.mubr.bf16.mxu1 %v3239_v9 }
 0x1b9   : > { %v1178_v39 = vadd.f32 %v1177_v57, %v2885_v0  ;;  %v1233_v28 = vpack.c.bf16 %v1205_v42, %v1197_v20  ;;  %v1179_v15 = vpop.f32.mrb[11].mxu1  ;;  %v1130_v21 = vpop.f32.mrb[12].mxu0  ;;  %v1198_v46 = vmax.f32 %v1174_v63, 0.0 }
 0x1ba   : > { %v1180_v1 = vadd.f32 %v1179_v15, %v2885_v0  ;;  %v1131_v43 = vadd.f32 %v1130_v21, %v2895_v7  ;;  %v1132_v51 = vpop.f32.mrb[13].mxu0  ;;  %v1199_v2 = vmax.f32 %v1176_v5, 0.0 }
 0x1bb   : > { %v1206_v17 = vmax.f32 %v1178_v39, 0.0  ;;  %v1133_v23 = vadd.f32 %v1132_v51, %v2895_v7  ;;  %v1134_v44 = vpop.f32.mrb[14].mxu0  ;;  %1390 = vmatprep.subr.bf16.mxu0 %v1233_v28 }
 0x1bc   : > { %v1207_v10 = vmax.f32 %v1180_v1, 0.0  ;;  %v1135_v26 = vadd.f32 %v1134_v44, %v2897_v19  ;;  %v1136_v49 = vpop.f32.mrb[15].mxu0  ;;  %1391 = vmatpush1.bf16.msra.mxu0 %v1232_v37  ;;  %v1212_v24 = vmax.f32 %v1131_v43, 0.0  ;;  %v2965_v1 = vpop.permute.xlu1 %1265 }
 0x1bd   : > { %v1234_v0 = vpack.c.bf16 %v1206_v17, %v1198_v46  ;;  %v1137_v18 = vadd.f32 %v1136_v49, %v2897_v19  ;;  %v1213_v3 = vmax.f32 %v1133_v23, 0.0 }
 0x1be   : > { %v1235_v32 = vpack.c.bf16 %v1207_v10, %v1199_v2  ;;  %v1183_v27 = vpop.f32.mrb[12].mxu1  ;;  %v1220_v50 = vmax.f32 %v1135_v26, 0.0  ;;  %2131 = vmatmul.mubr.msk.bf16.gmra.mrb[20].mxu0 %vm973_vm0, %v2208_v13 }
 0x1bf   : > { %v1184_v54 = vadd.f32 %v1183_v27, %v2895_v7  ;;  %v1185_v30 = vpop.f32.mrb[13].mxu1  ;;  %v1221_v16 = vmax.f32 %v1137_v18, 0.0  ;;  %2133 = vmatmul.mubr.msk.bf16.gmra.mrb[20].mxu1 %vm973_vm0, %v2208_v13  ;;  %1422 = vmatprep.mubr.bf16.mxu0 %v3239_v9 }
 0x1c0   : > { %v1186_v56 = vadd.f32 %v1185_v30, %v2895_v7  ;;  %v1240_v58 = vpack.c.bf16 %v1220_v50, %v1212_v24  ;;  %v1187_v22 = vpop.f32.mrb[14].mxu1  ;;  %1443 = vmatprep.subr.bf16.mxu1 %v1235_v32  ;;  %1475 = vmatprep.mubr.bf16.mxu1 %v3239_v9 }
 0x1c1   : > { %v1188_v40 = vadd.f32 %v1187_v22, %v2897_v19  ;;  %v1241_v38 = vpack.c.bf16 %v1221_v16, %v1213_v3  ;;  %v1189_v12 = vpop.f32.mrb[15].mxu1  ;;  %1444 = vmatpush1.bf16.msra.mxu1 %v1234_v0  ;;  %v1214_v36 = vmax.f32 %v1184_v54, 0.0 }
 0x1c2   : > { %v1190_v25 = vadd.f32 %v1189_v12, %v2897_v19  ;;  %v1215_v29 = vmax.f32 %v1186_v56, 0.0  ;;  %v2951_v19 = vpop.permute.xlu0 %1250 }
 0x1c3   : > { %v1222_v4 = vmax.f32 %v1188_v40, 0.0  ;;  %1392 = vmatprep.subr.bf16.mxu0 %v1241_v38 }
 0x1c4   : > { %v1223_v35 = vmax.f32 %v1190_v25, 0.0  ;;  %1393 = vmatpush1.bf16.msra.mxu0 %v1240_v58 }
 0x1c5   : > { %v1242_v14 = vpack.c.bf16 %v1222_v4, %v1214_v36 }
 0x1c6   : > { %v1243_v7 = vpack.c.bf16 %v1223_v35, %v1215_v29  ;;  %v2963_v39 = vpop.permute.xlu0 %1260 }
 0x1c7   : > { %2134 = vmatmul.mubr.msk.bf16.vlgmr.msra.gmra.mrb[24].mxu0 %vm973_vm0, %v2911_v48 }
 0x1c8   : > { %1445 = vmatprep.subr.bf16.mxu1 %v1243_v7  ;;  %1432 = vmatprep.mubr.bf16.mxu0 %v3239_v9 }
 0x1c9   : > { %1446 = vmatpush1.bf16.msra.mxu1 %v1242_v14 }
 0x1cc   : > { %2136 = vmatmul.mubr.msk.bf16.vlgmr.msra.gmra.mrb[24].mxu1 %vm973_vm0, %v2911_v48 }
 0x1cd   : > { %1485 = vmatprep.mubr.bf16.mxu1 %v3239_v9 }
 0x1cf   : > { %2135 = vmatmul.mubr.msk.bf16.gmra.mrb[28].mxu0 %vm973_vm0, %v2208_v13 }
 0x1d0   : > { %1620 = vmatprep.mubr.bf16.mxu0 %v3239_v9 }
 0x1d4   : > { %2137 = vmatmul.mubr.msk.bf16.gmra.mrb[28].mxu1 %vm973_vm0, %v2208_v13 }
 0x1d5   : > { %1673 = vmatprep.mubr.bf16.mxu1 %v3239_v9 }
 0x289   : > { %v1318_v34 = vpop.f32.mrb[16].mxu0 }
 0x28a   : > { %v1319_v6 = vadd.f32 %v1318_v34, %v2951_v19  ;;  %v1371_v31 = vpop.f32.mrb[16].mxu1  ;;  %v1320_v52 = vpop.f32.mrb[17].mxu0  ;;  %v2979_v34 = vld [vmem:[%s3174_s7] sm:$0xff]  }
 0x28b   : > { %v1372_v47 = vadd.f32 %v1371_v31, %v2951_v19  ;;  %v1321_v33 = vadd.f32 %v1320_v52, %v2951_v19  ;;  %v1373_v48 = vpop.f32.mrb[17].mxu1  ;;  %v1322_v53 = vpop.f32.mrb[18].mxu0 }
 0x28c   : > { %v1374_v61 = vadd.f32 %v1373_v48, %v2951_v19  ;;  %v1323_v55 = vadd.f32 %v1322_v53, %v2953_v8  ;;  %v1375_v45 = vpop.f32.mrb[18].mxu1  ;;  %v1324_v59 = vpop.f32.mrb[19].mxu0  ;;  %v1496_v63 = vmax.f32 %v1319_v6, 0.0 }
 0x28d   : > { %v1376_v60 = vadd.f32 %v1375_v45, %v2953_v8  ;;  %v1325_v62 = vadd.f32 %v1324_v59, %v2953_v8  ;;  %v1377_v11 = vpop.f32.mrb[19].mxu1  ;;  %v1498_v42 = vmax.f32 %v1372_v47, 0.0  ;;  %v1497_v5 = vmax.f32 %v1321_v33, 0.0 }
 0x28e   : > { %v1504_v20 = vmax.f32 %v1323_v55, 0.0  ;;  %v1378_v41 = vadd.f32 %v1377_v11, %v2953_v8  ;;  %v1499_v28 = vmax.f32 %v1374_v61, 0.0 }
 0x28f   : > { %v1506_v37 = vmax.f32 %v1376_v60, 0.0  ;;  %v1505_v57 = vmax.f32 %v1325_v62, 0.0 }
 0x290   : > { %v1532_v15 = vpack.c.bf16 %v1504_v20, %v1496_v63  ;;  %v1507_v21 = vmax.f32 %v1378_v41, 0.0 }
 0x291   : > { %v1534_v43 = vpack.c.bf16 %v1506_v37, %v1498_v42  ;;  %v1533_v51 = vpack.c.bf16 %v1505_v57, %v1497_v5  ;;  %v1328_v13 = vpop.f32.mrb[20].mxu0 }
 0x292   : > { %v1535_v46 = vpack.c.bf16 %v1507_v21, %v1499_v28  ;;  %v1329_v17 = vadd.f32 %v1328_v13, %v2963_v39  ;;  %v1381_v23 = vpop.f32.mrb[20].mxu1  ;;  %v1330_v44 = vpop.f32.mrb[21].mxu0 }
 0x293   : > { %v1382_v2 = vadd.f32 %v1381_v23, %v2963_v39  ;;  %v1331_v10 = vadd.f32 %v1330_v44, %v2963_v39  ;;  %v1383_v26 = vpop.f32.mrb[21].mxu1  ;;  %v1332_v49 = vpop.f32.mrb[22].mxu0  ;;  %1588 = vmatprep.subr.bf16.mxu0 %v1533_v51 }
 0x294   : > { %v1384_v0 = vadd.f32 %v1383_v26, %v2963_v39  ;;  %v1333_v18 = vadd.f32 %v1332_v49, %v2965_v1  ;;  %v1385_v32 = vpop.f32.mrb[22].mxu1  ;;  %1641 = vmatprep.subr.bf16.mxu1 %v1535_v46  ;;  %v1334_v24 = vpop.f32.mrb[23].mxu0  ;;  %1589 = vmatpush1.bf16.msra.mxu0 %v1532_v15  ;;  %v1512_v3 = vmax.f32 %v1329_v17, 0.0  ;;  %v2210_v15 = vld [vmem:[%s3174_s7 + $0x8] sm:$0xff]  }
 0x295   : > { %v1386_v27 = vadd.f32 %v1385_v32, %v2965_v1  ;;  %v1335_v50 = vadd.f32 %v1334_v24, %v2965_v1  ;;  %v1387_v54 = vpop.f32.mrb[23].mxu1  ;;  %1642 = vmatpush1.bf16.msra.mxu1 %v1534_v43  ;;  %v1514_v56 = vmax.f32 %v1382_v2, 0.0  ;;  %v1513_v58 = vmax.f32 %v1331_v10, 0.0 }
 0x296   : > { %v1520_v30 = vmax.f32 %v1333_v18, 0.0  ;;  %v1388_v16 = vadd.f32 %v1387_v54, %v2965_v1  ;;  %v1515_v38 = vmax.f32 %v1384_v0, 0.0 }
 0x297   : > { %v1522_v22 = vmax.f32 %v1386_v27, 0.0  ;;  %v1521_v40 = vmax.f32 %v1335_v50, 0.0 }
 0x298   : > { %v1540_v12 = vpack.c.bf16 %v1520_v30, %v1512_v3  ;;  %v1523_v25 = vmax.f32 %v1388_v16, 0.0 }
 0x299   : > { %v1542_v36 = vpack.c.bf16 %v1522_v22, %v1514_v56  ;;  %v1541_v4 = vpack.c.bf16 %v1521_v40, %v1513_v58 }
 0x29a   : > { %v1543_v29 = vpack.c.bf16 %v1523_v25, %v1515_v38  ;;  %v1424_v35 = vpop.f32.mrb[24].mxu0 }
 0x29b   : > { %v1425_v14 = vadd.f32 %v1424_v35, %v2951_v19  ;;  %v1426_v7 = vpop.f32.mrb[25].mxu0  ;;  %1590 = vmatprep.subr.bf16.mxu0 %v1541_v4 }
 0x29c   : > { %v1427_v6 = vadd.f32 %v1426_v7, %v2951_v19  ;;  %v1428_v31 = vpop.f32.mrb[26].mxu0  ;;  %1643 = vmatprep.subr.bf16.mxu1 %v1543_v29  ;;  %1591 = vmatpush1.bf16.msra.mxu0 %v1540_v12 }
 0x29d   : > { %v1429_v52 = vadd.f32 %v1428_v31, %v2953_v8  ;;  %v1430_v47 = vpop.f32.mrb[27].mxu0  ;;  %1644 = vmatpush1.bf16.msra.mxu1 %v1542_v36  ;;  %v1500_v48 = vmax.f32 %v1425_v14, 0.0  ;;  %v3021_v36 = vpop.permute.xlu1 %1559 }
 0x29e   : > { %v1431_v33 = vadd.f32 %v1430_v47, %v2953_v8  ;;  %v1501_v45 = vmax.f32 %v1427_v6, 0.0 }
 0x29f   : > { %v1477_v53 = vpop.f32.mrb[24].mxu1  ;;  %v1508_v61 = vmax.f32 %v1429_v52, 0.0  ;;  %2140 = vmatmul.mubr.msk.bf16.vlgmr.msra.gmra.mrb[32].mxu0 %vm973_vm0, %v2979_v34 }
 0x2a0   : > { %v1478_v55 = vadd.f32 %v1477_v53, %v2951_v19  ;;  %v1479_v59 = vpop.f32.mrb[25].mxu1  ;;  %v1509_v60 = vmax.f32 %v1431_v33, 0.0  ;;  %2142 = vmatmul.mubr.msk.bf16.vlgmr.msra.gmra.mrb[32].mxu1 %vm973_vm0, %v2979_v34  ;;  %1630 = vmatprep.mubr.bf16.mxu0 %v3239_v9 }
 0x2a1   : > { %v1480_v62 = vadd.f32 %v1479_v59, %v2951_v19  ;;  %v1536_v11 = vpack.c.bf16 %v1508_v61, %v1500_v48  ;;  %v1481_v63 = vpop.f32.mrb[26].mxu1  ;;  %1683 = vmatprep.mubr.bf16.mxu1 %v3239_v9  ;;  %v3025_v29 = vpop.permute.xlu1 %1569 }
 0x2a2   : > { %v1482_v20 = vadd.f32 %v1481_v63, %v2953_v8  ;;  %v1537_v41 = vpack.c.bf16 %v1509_v60, %v1501_v45  ;;  %v1483_v42 = vpop.f32.mrb[27].mxu1  ;;  %v1434_v5 = vpop.f32.mrb[28].mxu0  ;;  %v1502_v21 = vmax.f32 %v1478_v55, 0.0  ;;  %v2278_v55 = vmov 1966171168  }
 0x2a3   : > { %v1484_v37 = vadd.f32 %v1483_v42, %v2953_v8  ;;  %v1435_v57 = vadd.f32 %v1434_v5, %v2963_v39  ;;  %v1436_v28 = vpop.f32.mrb[29].mxu0  ;;  %v1503_v13 = vmax.f32 %v1480_v62, 0.0  ;;  %v3032_v45 = vunpack.c.l.s4 %v2278_v55 }
 0x2a4   : > { %v1510_v19 = vmax.f32 %v1482_v20, 0.0  ;;  %v1437_v43 = vadd.f32 %v1436_v28, %v2963_v39  ;;  %v1438_v51 = vpop.f32.mrb[30].mxu0  ;;  %1694 = vmatprep.subr.bf16.mxu0 %v1537_v41 }
 0x2a5   : > { %v1511_v46 = vmax.f32 %v1484_v37, 0.0  ;;  %v1439_v17 = vadd.f32 %v1438_v51, %v2965_v1  ;;  %v1440_v23 = vpop.f32.mrb[31].mxu0  ;;  %1695 = vmatpush1.bf16.msra.mxu0 %v1536_v11  ;;  %v1516_v10 = vmax.f32 %v1435_v57, 0.0  ;;  %v3037_v5 = vpop.permute.xlu1 %1843 }
 0x2a6   : > { %v1538_v8 = vpack.c.bf16 %v1510_v19, %v1502_v21  ;;  %v1441_v44 = vadd.f32 %v1440_v23, %v2965_v1  ;;  %v1517_v18 = vmax.f32 %v1437_v43, 0.0  ;;  %v1992_v19 = vunpack.c.0.s8 %v3032_v45 }
 0x2a7   : > { %v1539_v2 = vpack.c.bf16 %v1511_v46, %v1503_v13  ;;  %v1487_v26 = vpop.f32.mrb[28].mxu1  ;;  %v1524_v49 = vmax.f32 %v1439_v17, 0.0  ;;  %2141 = vmatmul.mubr.msk.bf16.gmra.mrb[36].mxu0 %vm973_vm0, %v2210_v15 }
 0x2a8   : > { %v1488_v0 = vadd.f32 %v1487_v26, %v2963_v39  ;;  %v1489_v32 = vpop.f32.mrb[29].mxu1  ;;  %v1525_v24 = vmax.f32 %v1441_v44, 0.0  ;;  %2143 = vmatmul.mubr.msk.bf16.gmra.mrb[36].mxu1 %vm973_vm0, %v2210_v15  ;;  %1726 = vmatprep.mubr.bf16.mxu0 %v3239_v9 }
 0x2a9   : > { %v1490_v27 = vadd.f32 %v1489_v32, %v2963_v39  ;;  %v1544_v50 = vpack.c.bf16 %v1524_v49, %v1516_v10  ;;  %v1491_v54 = vpop.f32.mrb[30].mxu1  ;;  %1747 = vmatprep.subr.bf16.mxu1 %v1539_v2  ;;  %1779 = vmatprep.mubr.bf16.mxu1 %v3239_v9 }
 0x2aa   : > { %v1492_v3 = vadd.f32 %v1491_v54, %v2965_v1  ;;  %v1545_v30 = vpack.c.bf16 %v1525_v24, %v1517_v18  ;;  %v1493_v16 = vpop.f32.mrb[31].mxu1  ;;  %1748 = vmatpush1.bf16.msra.mxu1 %v1538_v8  ;;  %v1518_v58 = vmax.f32 %v1488_v0, 0.0 }
 0x2ab   : > { %v1494_v56 = vadd.f32 %v1493_v16, %v2965_v1  ;;  %v1519_v40 = vmax.f32 %v1490_v27, 0.0  ;;  %v3017_v1 = vpop.permute.xlu0 %1554 }
 0x2ac   : > { %v1526_v22 = vmax.f32 %v1492_v3, 0.0  ;;  %1696 = vmatprep.subr.bf16.mxu0 %v1545_v30 }
 0x2ad   : > { %v1527_v38 = vmax.f32 %v1494_v56, 0.0  ;;  %1697 = vmatpush1.bf16.msra.mxu0 %v1544_v50 }
 0x2ae   : > { %v1546_v12 = vpack.c.bf16 %v1526_v22, %v1518_v58 }
 0x2af   : > { %v1547_v39 = vpack.c.bf16 %v1527_v38, %v1519_v40  ;;  %v3019_v25 = vpop.permute.xlu0 %1564 }
 0x2b0   : > { %2144 = vmatmul.mubr.msk.bf16.vlgmr.msra.gmra.mrb[40].mxu0 %vm973_vm0, %v2979_v34 }
 0x2b1   : > { %1749 = vmatprep.subr.bf16.mxu1 %v1547_v39  ;;  %1736 = vmatprep.mubr.bf16.mxu0 %v3239_v9 }
 0x2b2   : > { %1750 = vmatpush1.bf16.msra.mxu1 %v1546_v12 }
 0x2b3   : > { %v3023_v4 = vpop.permute.xlu0 %1838 }
 0x2b5   : > { %2146 = vmatmul.mubr.msk.bf16.vlgmr.msra.gmra.mrb[40].mxu1 %vm973_vm0, %v2979_v34 }
 0x2b6   : > { %1789 = vmatprep.mubr.bf16.mxu1 %v3239_v9 }
 0x2b7   : > { %v3042_v43 = vpop.permute.xlu0 %1848 }
 0x2b8   : > { %2145 = vmatmul.mubr.msk.bf16.gmra.mrb[44].mxu0 %vm973_vm0, %v2210_v15 }
 0x2bd   : > { %2147 = vmatmul.mubr.msk.bf16.gmra.mrb[44].mxu1 %vm973_vm0, %v2210_v15 }
 0x372   : > { %v1622_v35 = vpop.f32.mrb[32].mxu0 }
 0x373   : > { %v1623_v14 = vadd.f32 %v1622_v35, %v3017_v1  ;;  %v1675_v7 = vpop.f32.mrb[32].mxu1  ;;  %v1624_v34 = vpop.f32.mrb[33].mxu0 }
 0x374   : > { %v1676_v9 = vadd.f32 %v1675_v7, %v3017_v1  ;;  %v1625_v6 = vadd.f32 %v1624_v34, %v3017_v1  ;;  %v1677_v31 = vpop.f32.mrb[33].mxu1  ;;  %v1626_v52 = vpop.f32.mrb[34].mxu0 }
 0x375   : > { %v1800_v47 = vmax.f32 %v1623_v14, 0.0  ;;  %v1678_v33 = vadd.f32 %v1677_v31, %v3017_v1  ;;  %v1627_v48 = vadd.f32 %v1626_v52, %v3021_v36  ;;  %v1679_v53 = vpop.f32.mrb[34].mxu1  ;;  %v1628_v61 = vpop.f32.mrb[35].mxu0 }
 0x376   : > { %v1802_v59 = vmax.f32 %v1676_v9, 0.0  ;;  %v1801_v60 = vmax.f32 %v1625_v6, 0.0  ;;  %v1680_v62 = vadd.f32 %v1679_v53, %v3021_v36  ;;  %v1629_v11 = vadd.f32 %v1628_v61, %v3021_v36  ;;  %v1681_v63 = vpop.f32.mrb[35].mxu1  ;;  %v3059_v9 = vpop.permute.xlu1 %1853 }
 0x377   : > { %v1803_v20 = vmax.f32 %v1678_v33, 0.0  ;;  %v1808_v41 = vmax.f32 %v1627_v48, 0.0  ;;  %v1682_v42 = vadd.f32 %v1681_v63, %v3021_v36  ;;  %v1856_v28 = vmul.f32 %v3023_v4, %v1800_v47  ;;  %v1964_v33 = vpop.permute.xlu0 %1963 }
 0x378   : > { %v1810_v37 = vmax.f32 %v1680_v62, 0.0  ;;  %v1809_v57 = vmax.f32 %v1629_v11, 0.0  ;;  %v1858_v51 = vmul.f32 %v3023_v4, %v1802_v59  ;;  %v1857_v13 = vmul.f32 %v3023_v4, %v1801_v60 }
 0x379   : > { %v1864_v15 = vmul.f32 %v3037_v5, %v1808_v41  ;;  %v1811_v21 = vmax.f32 %v1682_v42, 0.0  ;;  %v1859_v8 = vmul.f32 %v3023_v4, %v1803_v20  ;;  %v3243_v42 = vld [vmem:[#allocation7_spill] sm:$0xff] }
 0x37a   : > { %v1866_v46 = vmul.f32 %v3037_v5, %v1810_v37  ;;  %v1865_v17 = vmul.f32 %v3037_v5, %v1809_v57  ;;  %v1632_v23 = vpop.f32.mrb[36].mxu0  ;;  %v3069_v37 = vrot.slane %v1964_v33, %v3243_v42 }
 0x37b   : > { %v1888_v44 = vadd.f32 %v1864_v15, %v1856_v28  ;;  %v1867_v2 = vmul.f32 %v3037_v5, %v1811_v21  ;;  %v1633_v10 = vadd.f32 %v1632_v23, %v3019_v25  ;;  %v1685_v26 = vpop.f32.mrb[36].mxu1  ;;  %v1634_v49 = vpop.f32.mrb[37].mxu0  ;;  %v3244_v23 = vld [vmem:[#allocation6_spill] sm:$0xff] }
 0x37c   : > { %v1906_v0 = vadd.f32 %v1866_v46, %v1858_v51  ;;  %v1897_v18 = vadd.f32 %v1865_v17, %v1857_v13  ;;  %v1686_v32 = vadd.f32 %v1685_v26, %v3019_v25  ;;  %v1635_v24 = vadd.f32 %v1634_v49, %v3019_v25  ;;  %v1687_v27 = vpop.f32.mrb[37].mxu1  ;;  %v1636_v50 = vpop.f32.mrb[38].mxu0 }
 0x37d   : > { %v1915_v54 = vadd.f32 %v1867_v2, %v1859_v8  ;;  %v1816_v3 = vmax.f32 %v1633_v10, 0.0  ;;  %v1688_v30 = vadd.f32 %v1687_v27, %v3019_v25  ;;  %v1637_v16 = vadd.f32 %v1636_v50, %v3025_v29  ;;  %v1689_v56 = vpop.f32.mrb[38].mxu1  ;;  %v1638_v58 = vpop.f32.mrb[39].mxu0 }
 0x37e   : > { %v1818_v22 = vmax.f32 %v1686_v32, 0.0  ;;  %v1817_v40 = vmax.f32 %v1635_v24, 0.0  ;;  %v1690_v38 = vadd.f32 %v1689_v56, %v3025_v29  ;;  %v1639_v12 = vadd.f32 %v1638_v58, %v3025_v29  ;;  %v1691_v39 = vpop.f32.mrb[39].mxu1 }
 0x37f   : > { %v1872_v35 = vmul.f32 %v3042_v43, %v1816_v3  ;;  %v1819_v14 = vmax.f32 %v1688_v30, 0.0  ;;  %v1824_v7 = vmax.f32 %v1637_v16, 0.0  ;;  %v1692_v34 = vadd.f32 %v1691_v39, %v3025_v29 }
 0x380   : > { %v1874_v6 = vmul.f32 %v3042_v43, %v1818_v22  ;;  %v1873_v31 = vmul.f32 %v3042_v43, %v1817_v40  ;;  %v1826_v52 = vmax.f32 %v1690_v38, 0.0  ;;  %v1825_v47 = vmax.f32 %v1639_v12, 0.0 }
 0x381   : > { %v1889_v48 = vadd.f32 %v1888_v44, %v1872_v35  ;;  %v1875_v53 = vmul.f32 %v3042_v43, %v1819_v14  ;;  %v1880_v61 = vmul.f32 %v3059_v9, %v1824_v7  ;;  %v1827_v55 = vmax.f32 %v1692_v34, 0.0 }
 0x382   : > { %v1907_v45 = vadd.f32 %v1906_v0, %v1874_v6  ;;  %v1898_v59 = vadd.f32 %v1897_v18, %v1873_v31  ;;  %v1882_v60 = vmul.f32 %v3059_v9, %v1826_v52  ;;  %v1881_v62 = vmul.f32 %v3059_v9, %v1825_v47 }
 0x383   : > { %v1916_v11 = vadd.f32 %v1915_v54, %v1875_v53  ;;  %v1890_v63 = vadd.f32 %v1889_v48, %v1880_v61  ;;  %v1883_v20 = vmul.f32 %v3059_v9, %v1827_v55  ;;  %v1728_v41 = vpop.f32.mrb[40].mxu0  ;;  %v3074_v8 = vsub.s32 %v1992_v19, %v3244_v23 }
 0x384   : > { %v1908_v57 = vadd.f32 %v1907_v45, %v1882_v60  ;;  %v1899_v28 = vadd.f32 %v1898_v59, %v1881_v62  ;;  %v1729_v15 = vadd.f32 %v1728_v41, %v3017_v1  ;;  %v1730_v21 = vpop.f32.mrb[41].mxu0 }
 0x385   : > { %v1891_v51 = vrot.slane %v1890_v63, 4  ;;  %v1917_v13 = vadd.f32 %v1916_v11, %v1883_v20  ;;  %v1731_v46 = vadd.f32 %v1730_v21, %v3017_v1  ;;  %v1732_v17 = vpop.f32.mrb[42].mxu0 }
 0x386   : > { %v1909_v44 = vrot.slane %v1908_v57, 4  ;;  %v1900_v2 = vrot.slane %v1899_v28, 4  ;;  %v1804_v10 = vmax.f32 %v1729_v15, 0.0  ;;  %v1733_v26 = vadd.f32 %v1732_v17, %v3021_v36  ;;  %v1734_v49 = vpop.f32.mrb[43].mxu0 }
 0x387   : > { %v1892_v0 = vadd.f32 %v1891_v51, %v1890_v63  ;;  %v1918_v18 = vrot.slane %v1917_v13, 4  ;;  %v1805_v32 = vmax.f32 %v1731_v46, 0.0  ;;  %v1735_v24 = vadd.f32 %v1734_v49, %v3021_v36 }
 0x388   : > { %v1910_v27 = vadd.f32 %v1909_v44, %v1908_v57  ;;  %v1901_v50 = vadd.f32 %v1900_v2, %v1899_v28  ;;  %v1860_v54 = vmul.f32 %v3023_v4, %v1804_v10  ;;  %v1781_v3 = vpop.f32.mrb[40].mxu1  ;;  %v1812_v30 = vmax.f32 %v1733_v26, 0.0 }
 0x389   : > { %v1893_v16 = vrot.slane %v1892_v0, 2  ;;  %v1919_v19 = vadd.f32 %v1918_v18, %v1917_v13  ;;  %v1782_v56 = vadd.f32 %v1781_v3, %v3017_v1  ;;  %v1861_v58 = vmul.f32 %v3023_v4, %v1805_v32  ;;  %v1783_v22 = vpop.f32.mrb[41].mxu1 }
 0x38a   : > { %v1911_v40 = vrot.slane %v1910_v27, 2  ;;  %v1902_v38 = vrot.slane %v1901_v50, 2  ;;  %v1784_v12 = vadd.f32 %v1783_v22, %v3017_v1  ;;  %v1868_v39 = vmul.f32 %v3037_v5, %v1812_v30  ;;  %v1785_v35 = vpop.f32.mrb[42].mxu1 }
 0x38b   : > { %v1894_v14 = vadd.f32 %v1893_v16, %v1892_v0  ;;  %v1920_v7 = vrot.slane %v1919_v19, 2  ;;  %v1806_v34 = vmax.f32 %v1782_v56, 0.0  ;;  %v1786_v6 = vadd.f32 %v1785_v35, %v3021_v36  ;;  %v1787_v31 = vpop.f32.mrb[43].mxu1  ;;  %v1738_v52 = vpop.f32.mrb[44].mxu0 }
 0x38c   : > { %v1912_v47 = vadd.f32 %v1911_v40, %v1910_v27  ;;  %v1903_v33 = vadd.f32 %v1902_v38, %v1901_v50  ;;  %v1807_v48 = vmax.f32 %v1784_v12, 0.0  ;;  %v1924_v53 = vadd.f32 %v1868_v39, %v1860_v54  ;;  %v1740_v61 = vpop.f32.mrb[45].mxu0 }
 0x38d   : > { %v1895_v55 = vrot.slane %v1894_v14, 1  ;;  %v1921_v45 = vadd.f32 %v1920_v7, %v1919_v19  ;;  %v1862_v59 = vmul.f32 %v3023_v4, %v1806_v34  ;;  %v1814_v1 = vmax.f32 %v1786_v6, 0.0  ;;  %v1742_v60 = vpop.f32.mrb[46].mxu0 }
 0x38e   : > { %v1913_v62 = vrot.slane %v1912_v47, 1  ;;  %v1904_v11 = vrot.slane %v1903_v33, 1  ;;  %v1863_v63 = vmul.f32 %v3023_v4, %v1807_v48  ;;  %v1813_v20 = vmax.f32 %v1735_v24, 0.0  ;;  %v1744_v41 = vpop.f32.mrb[47].mxu0 }
 0x38f   : > { %v1896_v42 = vadd.f32 %v1895_v55, %v1894_v14  ;;  %v1922_v57 = vrot.slane %v1921_v45, 1  ;;  %v1870_v28 = vmul.f32 %v3037_v5, %v1814_v1  ;;  %v1788_v15 = vadd.f32 %v1787_v31, %v3021_v36 }
 0x390   : > { %v1914_v21 = vadd.f32 %v1913_v62, %v1912_v47  ;;  %v1905_v51 = vadd.f32 %v1904_v11, %v1903_v33  ;;  %v1869_v13 = vmul.f32 %v3037_v5, %v1813_v20  ;;  %v1739_v46 = vadd.f32 %v1738_v52, %v3019_v25  ;;  %v1791_v17 = vpop.f32.mrb[44].mxu1 }
 0x391   : > { %v1970_v23 = vadd.f32 %v3069_v37, %v1896_v42  ;;  %v1923_v44 = vadd.f32 %v1922_v57, %v1921_v45  ;;  %v1942_v2 = vadd.f32 %v1870_v28, %v1862_v59  ;;  %v1815_v4 = vmax.f32 %v1788_v15, 0.0  ;;  %v1793_v10 = vpop.f32.mrb[45].mxu1 }
 0x392   : > { %v1972_v26 = vadd.f32 %v3069_v37, %v1914_v21  ;;  %v1971_v49 = vadd.f32 %v3069_v37, %v1905_v51  ;;  %v1933_v0 = vadd.f32 %v1869_v13, %v1861_v58  ;;  %v1820_v18 = vmax.f32 %v1739_v46, 0.0  ;;  %v1795_v36 = vpop.f32.mrb[46].mxu1 }
 0x393   : > { %v1973_v32 = vadd.f32 %v3069_v37, %v1923_v44  ;;  %v1871_v24 = vmul.f32 %v3037_v5, %v1815_v4  ;;  %v1792_v27 = vadd.f32 %v1791_v17, %v3019_v25  ;;  %v1741_v50 = vadd.f32 %v1740_v61, %v3019_v25  ;;  %v1797_v54 = vpop.f32.mrb[47].mxu1 }
 0x394   : > { %v1876_v3 = vmul.f32 %v3042_v43, %v1820_v18  ;;  %v1794_v30 = vadd.f32 %v1793_v10, %v3019_v25  ;;  %v1743_v16 = vadd.f32 %v1742_v60, %v3025_v29  ;;  %v1796_v19 = vadd.f32 %v1795_v36, %v3025_v29 }
 0x395   : > { %v1951_v56 = vadd.f32 %v1871_v24, %v1863_v63  ;;  %v1822_v58 = vmax.f32 %v1792_v27, 0.0  ;;  %v1821_v22 = vmax.f32 %v1741_v50, 0.0  ;;  %v1745_v40 = vadd.f32 %v1744_v41, %v3025_v29 }
 0x396   : > { %v1925_v38 = vadd.f32 %v1924_v53, %v1876_v3  ;;  %v1823_v5 = vmax.f32 %v1794_v30, 0.0  ;;  %v1828_v12 = vmax.f32 %v1743_v16, 0.0  ;;  %v1830_v39 = vmax.f32 %v1796_v19, 0.0 }
 0x397   : > { %v1878_v35 = vmul.f32 %v3042_v43, %v1822_v58  ;;  %v1877_v14 = vmul.f32 %v3042_v43, %v1821_v22  ;;  %v1829_v7 = vmax.f32 %v1745_v40, 0.0  ;;  %v1798_v25 = vadd.f32 %v1797_v54, %v3025_v29 }
 0x398   : > { %v1879_v34 = vmul.f32 %v3042_v43, %v1823_v5  ;;  %v1884_v6 = vmul.f32 %v3059_v9, %v1828_v12  ;;  %v1886_v31 = vmul.f32 %v3059_v9, %v1830_v39  ;;  %v1986_v52 = vcombine.low %v1970_v23, %v1971_v49 }
 0x399   : > { %v1943_v47 = vadd.f32 %v1942_v2, %v1878_v35  ;;  %v1934_v33 = vadd.f32 %v1933_v0, %v1877_v14  ;;  %v1885_v48 = vmul.f32 %v3059_v9, %v1829_v7  ;;  %v1831_v53 = vmax.f32 %v1798_v25, 0.0 }
 0x39a   : > { %v1952_v61 = vadd.f32 %v1951_v56, %v1879_v34  ;;  %v1926_v55 = vadd.f32 %v1925_v38, %v1884_v6  ;;  %v1987_v45 = vcombine.low %v1972_v26, %v1973_v32  ;;  %v1996_v59 = vrot.slane %v1986_v52, %v3074_v8 }
 0x39b   : > { %v1944_v1 = vadd.f32 %v1943_v47, %v1886_v31  ;;  %v1935_v60 = vadd.f32 %v1934_v33, %v1885_v48  ;;  %v1887_v29 = vmul.f32 %v3059_v9, %v1831_v53 }
 0x39c   : > { %v1927_v43 = vrot.slane %v1926_v55, 4  ;;  %v2003_v62 = vrot.slane %v1987_v45, %v3074_v8 }
 0x39d   : > { %v1945_v11 = vrot.slane %v1944_v1, 4  ;;  %v1936_v63 = vrot.slane %v1935_v60, 4  ;;  %v1953_v20 = vadd.f32 %v1952_v61, %v1887_v29 }
 0x39e   : > { %v1928_v41 = vadd.f32 %v1927_v43, %v1926_v55  ;;  %v2018_v42 = vcombine.low %v1996_v59, %v2003_v62 }
 0x39f   : > { %v1946_v57 = vadd.f32 %v1945_v11, %v1944_v1  ;;  %v1937_v28 = vadd.f32 %v1936_v63, %v1935_v60  ;;  %v1954_v15 = vrot.slane %v1953_v20, 4 }
 0x3a0   : > { %v1929_v21 = vrot.slane %v1928_v41, 2  ;;  %v2026_v58 = vrot.slane %v2018_v42, %v3074_v8 }
 0x3a1   : > { %v1947_v51 = vrot.slane %v1946_v57, 2  ;;  %v1938_v13 = vrot.slane %v1937_v28, 2  ;;  %v1955_v46 = vadd.f32 %v1954_v15, %v1953_v20 }
 0x3a2   : > { %v1930_v17 = vadd.f32 %v1929_v21, %v1928_v41 }
 0x3a3   : > { %v1948_v23 = vadd.f32 %v1947_v51, %v1946_v57  ;;  %v1939_v44 = vadd.f32 %v1938_v13, %v1937_v28  ;;  %v1956_v9 = vrot.slane %v1955_v46, 2 }
 0x3a4   : > { %v1931_v2 = vrot.slane %v1930_v17, 1 }
 0x3a5   : > { %v1949_v4 = vrot.slane %v1948_v23, 1  ;;  %v1940_v10 = vrot.slane %v1939_v44, 1  ;;  %v1957_v26 = vadd.f32 %v1956_v9, %v1955_v46 }
 0x3a6   : > { %v1932_v49 = vadd.f32 %v1931_v2, %v1930_v17 }
 0x3a7   : > { %v1950_v0 = vadd.f32 %v1949_v4, %v1948_v23  ;;  %v1941_v18 = vadd.f32 %v1940_v10, %v1939_v44  ;;  %v1958_v36 = vrot.slane %v1957_v26, 1 }
 0x3a8   : > { %v1974_v32 = vadd.f32 %v3069_v37, %v1932_v49 }
 0x3a9   : > { %v1976_v24 = vadd.f32 %v3069_v37, %v1950_v0  ;;  %v1975_v27 = vadd.f32 %v3069_v37, %v1941_v18  ;;  %v1959_v50 = vadd.f32 %v1958_v36, %v1957_v26 }
 0x3ab   : > { %v1977_v54 = vadd.f32 %v3069_v37, %v1959_v50  ;;  %v1988_v3 = vcombine.low %v1974_v32, %v1975_v27 }
 0x3ad   : > { %v1989_v30 = vcombine.low %v1976_v24, %v1977_v54  ;;  %v2010_v16 = vrot.slane %v1988_v3, %v3074_v8 }
 0x3af   : > { %v2017_v19 = vrot.slane %v1989_v30, %v3074_v8 }
 0x3b1   : > { %v2019_v56 = vcombine.low %v2010_v16, %v2017_v19 }
 0x3b3   : > { %v2033_v22 = vrot.slane %v2019_v56, %v3074_v8 }
 0x3b5   : > { %v2034_v40 = vcombine.low %v2026_v58, %v2033_v22 }
 0x3b7   : > { %2036 = vst [vmem:[%s382_s13] sm:$0xff] %v2034_v40 }
 0x3b8   : > { %2224 = shalt.err (!%p2221_p3)
}
 0x3b9   : > { %s2225_s26 = scalar_lea.hbm %s3125_s17, 128  ;;  %s2229_s15 = scalar_lea.hbm %s3178_s11, 256 }
 0x3ba   : > { %p2226_p4 = scmp.ne.s32.totalorder %s3125_s17, %s2225_s26  ;;  %p2230_p9 = scmp.lt.u32.totalorder %s3125_s17, %s3178_s11 }
 0x3bb   : > { %p2231_p10 = scmp.lt.u32.totalorder %s2229_s15, %s2225_s26  ;;  %p2233_p12 = scmp.lt.u32.totalorder %s2225_s26, %s3125_s17 }
 0x3bc   : > { %p2227_p7 = pnand %p2226_p4, %p2381_p5 }
 0x3bd   : > { %p2232_p11 = por %p2231_p10, %p2230_p9 }
 0x3be   : > { %p2228_p8 = pneg %p2227_p7 }
 0x3bf   : > { %p2234_p13 = por %p2233_p12, %p2232_p11 }
 0x3c1   : > { %p2235_p0 = pnand %p2234_p13, %p2228_p8 }
 0x3c3   : > { %2238 = shalt.err (!%p2235_p0)
}
 0x3c4   : > { %2154 = dma.vmem_to_hbm [thread:$0]  (%p2381_p5), %s3127_s14, 128, %s3125_s17, %s2038_s18  }
 0x3c5 PF: > { %p2160_p1 = scmp.ge.s32.totalorder %s2273_s22, 2  ;;  %s2064_s10 = sand.u32 1, %s2261_s19  }
 0x3c6   : > { %s2065_s25 = scalar_lea.sflag [#allocation4], %s2064_s10 }
 0x3c7   : > { %p2157_p2 = pnand %p2160_p1, %p2385_p6 }
 0x3c9   : > { %2256 = dma.done.wait (!%p2157_p2), %s2065_s25, 128  }
 0x3ca   : > { %2258 = vsyncadd (!%p2157_p2), %s2065_s25, 4294967168  ;;  %p23_p3 = scmp.ge.s32.totalorder %s2368_s24, 4   ;;  %s3245_s19 = smov %s2265_s20 }
 0x3cb   : > { %s3246_s20 = smov %s2269_s21  ;;  %s3247_s21 = smov %s2379_s27 }
 0x3cc   : > { %s3248_s22 = smov %s2368_s24  ;;  %25 = sbr.rel (!%p23_p3) target bundleno = 6 (0x6), region = 99 }
 0x3d3   :  { %2070 = vsyncpa [#allocation4], 1 }
 0x3d4   :  { %2072 = vsyncpa [#allocation4 + $0x1], 1 }

</bundles_post_ra>
